<compile_context>
chip_gen: v5e
topology: v5e:2x2
jax: 0.10.0
libtpu: 0.0.40
codegen_flags: <defaults>
</compile_context>

<pallas_src>
import functools

import jax
import jax.numpy as jnp
from jax.experimental import pallas as pl
from jax.experimental.pallas import tpu as pltpu


# ------------------------- helpers (match the PyTorch module) -------------------------

def _make_divisible(v, divisor, min_value=None):
    if min_value is None:
        min_value = divisor
    new_v = max(min_value, int(v + divisor / 2) // divisor * divisor)
    if new_v < 0.9 * v:
        new_v += divisor
    return new_v


def _relu6(v):
    return jnp.clip(v, 0.0, 6.0)


def _h_swish(v):
    return v * _relu6(v + 3.0) * (1.0 / 6.0)


def _h_sigmoid(v):
    return _relu6(v + 3.0) * (1.0 / 6.0)


# ------------------------------------ Pallas kernel ------------------------------------

def inverted_residual_kernel(
    x_ref,      # (Cin,  N)     N = bpg*HW lanes: channels on sublanes, batch*spatial on lanes
    w1_ref,     # (Chid, Cin)   1x1 expand conv weight (bf16), BN1 scale folded into rows
    fc1w_ref,   # (Cse,  Chid)  SE fc1 weight
    fc2w_ref,   # (Chid, Cse)   SE fc2 weight
    w3_ref,     # (Cout, Chid)  1x1 project conv weight (bf16), BN3 scale folded into rows
    p_ref,      # (Cmax, 5+K)   packed per-channel params: b1 | b2 | fc2b | b3 | fc1b | dw taps
    o_ref,      # (Cout, N)
    *, K, pad, W, HW, bpg, identity,
):
    N = bpg * HW
    Chid = w1_ref.shape[0]
    Cse = fc1w_ref.shape[0]
    Cout = w3_ref.shape[0]

    x = x_ref[...]                               # f32 (kept f32 for the identity add)
    p = p_ref[...]
    b1 = p[:Chid, 0:1]
    b2 = p[:Chid, 1:2]
    fc2b = p[:Chid, 2:3]
    b3 = p[:Cout, 3:4]
    fc1b = p[:Cse, 4:5]
    taps = p[:Chid, 5:5 + K]                     # depthwise taps with BN2 scale folded

    # --- 1x1 expand conv (+ folded BN1) + h_swish: explicit bf16 single-pass MXU, f32 acc ---
    t = jnp.dot(w1_ref[...], x.astype(jnp.bfloat16),
                preferred_element_type=jnp.float32) + b1                         # (Chid, N)
    t = _h_swish(t)

    # --- depthwise conv, kernel (1,K), stride 1, padding (0,pad); lane rolls + masks.
    # Each image spans a multiple of W lanes, so the w-coordinate masks also kill
    # cross-image leakage from the roll over the fused lane axis.
    col = jax.lax.broadcasted_iota(jnp.int32, (1, N), 1) % W                     # w-coord / lane
    acc = None
    for k in range(K):                                                           # static unroll
        off = k - pad
        tk = t if off == 0 else pltpu.roll(t, (-off) % N, axis=1)
        if off > 0:
            tk = jnp.where(col < (W - off), tk, 0.0)
        elif off < 0:
            tk = jnp.where(col >= (-off), tk, 0.0)
        term = tk * taps[:, k:k + 1]
        acc = term if acc is None else acc + term
    t2 = acc + b2                                                                # (Chid, N)

    # --- SE: per-image global average pool (lane reduce on 128-aligned slices),
    #         batched fc1 -> ReLU -> fc2 -> h_sigmoid across all images in one pass ---
    pools = [jnp.mean(t2[:, i * HW:(i + 1) * HW], axis=1, keepdims=True)
             for i in range(bpg)]
    yp = pools[0] if bpg == 1 else jnp.concatenate(pools, axis=1)                # (Chid, bpg)
    y = jnp.maximum(
        jnp.dot(fc1w_ref[...], yp, preferred_element_type=jnp.float32) + fc1b, 0.0)
    y = _h_sigmoid(
        jnp.dot(fc2w_ref[...], y, preferred_element_type=jnp.float32) + fc2b)    # (Chid, bpg)

    if bpg == 1:
        t2 = t2 * y
    else:
        t2 = jnp.concatenate(
            [t2[:, i * HW:(i + 1) * HW] * y[:, i:i + 1] for i in range(bpg)], axis=1)
    t2 = _h_swish(t2)                                                            # SE scale, then h_swish

    # --- 1x1 project conv (+ folded BN3): bf16 single-pass MXU, f32 acc ---
    out = jnp.dot(w3_ref[...], t2.astype(jnp.bfloat16),
                  preferred_element_type=jnp.float32) + b3                       # (Cout, N)

    if identity:
        out = out + x

    o_ref[...] = out.astype(o_ref.dtype)


# --------------------------------- wrapper (glue code) ---------------------------------

def inverted_residual_pallas(x_nchw, params, *, kernel_size, stride, batch_per_step=None):
    assert stride == 1, "TODO(synk): stride=2 path not lowered in the kernel"
    B, Cin, H, W = x_nchw.shape
    K = kernel_size
    pad = (K - 1) // 2
    HW = H * W
    eps = 1e-5

    # All of the batch fused into the lane axis by default (one grid step).
    # On v7x with large B one can set batch_per_step = B // 2 to keep both TCs busy.
    bpg = B if batch_per_step is None else batch_per_step
    assert B % bpg == 0
    N = bpg * HW
    assert N % 128 == 0, "TODO(synk): pad lanes to 128 and mask depthwise + SE-mean denominator"

    def fold(g, b, m, v):
        s = g / jnp.sqrt(v + eps)
        return s, b - m * s

    s1, b1 = fold(params["g1"], params["b1"], params["m1"], params["v1"])
    s2, b2 = fold(params["g2"], params["b2"], params["m2"], params["v2"])
    s3, b3 = fold(params["g3"], params["b3"], params["m3"], params["v3"])

    # 1x1-conv weights shipped bf16 (explicit single-pass MXU + half the DMA bytes);
    # per-channel taps/biases stay f32 (VPU side).
    w1 = (params["w1"][:, :, 0, 0] * s1[:, None]).astype(jnp.bfloat16)   # (Chid, Cin)
    dw = (params["dw"][:, 0, 0, :] * s2[:, None]).astype(jnp.float32)    # (Chid, K)
    w3 = (params["w3"][:, :, 0, 0] * s3[:, None]).astype(jnp.bfloat16)   # (Cout, Chid)
    fc1w = params["fc1w"].astype(jnp.float32)                            # (Cse, Chid)
    fc2w = params["fc2w"].astype(jnp.float32)                            # (Chid, Cse)

    Chid = w1.shape[0]
    Cout = w3.shape[0]
    Cse = fc1w.shape[0]
    identity = (stride == 1) and (Cin == Cout)
    Cmax = max(Chid, Cout, Cse)

    def col_pad(v):
        return jnp.pad(v, (0, Cmax - v.shape[0]))[:, None]

    # single packed param table (one DMA instead of ~10 tiny ones)
    pvec = jnp.concatenate(
        [col_pad(b1), col_pad(b2), col_pad(params["fc2b"]),
         col_pad(b3), col_pad(params["fc1b"]),
         jnp.pad(dw, ((0, Cmax - Chid), (0, 0)))],
        axis=1).astype(jnp.float32)                                      # (Cmax, 5+K)

    # Fuse batch into the lane axis: (B, Cin, H, W) -> (Cin, B*HW).
    x2 = jnp.transpose(x_nchw, (1, 0, 2, 3)).reshape(Cin, B * HW)

    num_groups = B // bpg

    kernel = functools.partial(inverted_residual_kernel,
                               K=K, pad=pad, W=W, HW=HW, bpg=bpg, identity=identity)

    full = lambda shape: pl.BlockSpec(shape, lambda g: (0,) * len(shape))

    out2 = pl.pallas_call(
        kernel,
        out_shape=jax.ShapeDtypeStruct((Cout, B * HW), x_nchw.dtype),
        grid_spec=pltpu.PrefetchScalarGridSpec(
            num_scalar_prefetch=0,
            grid=(num_groups,),
            in_specs=[
                pl.BlockSpec((Cin, N), lambda g: (0, g)),
                full((Chid, Cin)),
                full((Cse, Chid)),
                full((Chid, Cse)),
                full((Cout, Chid)),
                full((Cmax, 5 + K)),
            ],
            out_specs=pl.BlockSpec((Cout, N), lambda g: (0, g)),
        ),
        compiler_params=pltpu.CompilerParams(
            dimension_semantics=("parallel",),
            vmem_limit_bytes=32 * 1024 * 1024),
    )(x2, w1, fc1w, fc2w, w3, pvec)

    # (Cout, B*HW) -> (B, Cout, H, W)
    return jnp.transpose(out2.reshape(Cout, B, H, W), (1, 0, 2, 3))


# ------------------------------ pure-JAX reference (NCHW) ------------------------------

def inverted_residual_ref(x, p, *, kernel_size, stride):
    eps = 1e-5
    K = kernel_size
    pad = (K - 1) // 2
    B, Cin, H, W = x.shape
    Chid = p["w1"].shape[0]
    Cout = p["w3"].shape[0]
    identity = (stride == 1) and (Cin == Cout)

    def bn(v, g, b, m, var):
        return ((v - m[None, :, None, None]) / jnp.sqrt(var[None, :, None, None] + eps)
                * g[None, :, None, None] + b[None, :, None, None])

    hswish = lambda v: v * jnp.clip(v + 3.0, 0.0, 6.0) / 6.0

    dn = ("NCHW", "OIHW", "NCHW")
    prec = jax.lax.Precision.HIGHEST

    t = jax.lax.conv_general_dilated(x, p["w1"], (1, 1), [(0, 0), (0, 0)],
                                     dimension_numbers=dn, precision=prec)
    t = hswish(bn(t, p["g1"], p["b1"], p["m1"], p["v1"]))
    t = jax.lax.conv_general_dilated(t, p["dw"], (1, stride), [(0, 0), (pad, pad)],
                                     dimension_numbers=dn,
                                     feature_group_count=Chid, precision=prec)
    t = bn(t, p["g2"], p["b2"], p["m2"], p["v2"])
    # SE
    y = jnp.mean(t, axis=(2, 3))
    y = jnp.maximum(y @ p["fc1w"].T + p["fc1b"], 0.0)
    y = jnp.clip(y @ p["fc2w"].T + p["fc2b"] + 3.0, 0.0, 6.0) / 6.0
    t = t * y[:, :, None, None]
    t = hswish(t)
    t = jax.lax.conv_general_dilated(t, p["w3"], (1, 1), [(0, 0), (0, 0)],
                                     dimension_numbers=dn, precision=prec)
    t = bn(t, p["g3"], p["b3"], p["m3"], p["v3"])
    return x + t if identity else t


# ---------------------------------------- main -----------------------------------------

if __name__ == "__main__":
    # Module config: InvertedResidual(inp=16, hidden_dim=64, oup=16, kernel_size=3,
    #                                 stride=1, use_se=True, use_hs=True, is_psd=False)
    B, Cin, H, W = 2, 16, 8, 16
    Chid, Cout, K, stride = 64, 16, 3, 1
    Cse = _make_divisible(Chid // 4, 8)

    key = jax.random.PRNGKey(0)
    keys = jax.random.split(key, 20)

    params = {
        "w1":   0.1 * jax.random.normal(keys[0], (Chid, Cin, 1, 1), jnp.float32),
        "g1":   1.0 + 0.1 * jax.random.normal(keys[1], (Chid,), jnp.float32),
        "b1":   0.1 * jax.random.normal(keys[2], (Chid,), jnp.float32),
        "m1":   0.1 * jax.random.normal(keys[3], (Chid,), jnp.float32),
        "v1":   0.5 + jax.random.uniform(keys[4], (Chid,), jnp.float32),
        "dw":   0.1 * jax.random.normal(keys[5], (Chid, 1, 1, K), jnp.float32),
        "g2":   1.0 + 0.1 * jax.random.normal(keys[6], (Chid,), jnp.float32),
        "b2":   0.1 * jax.random.normal(keys[7], (Chid,), jnp.float32),
        "m2":   0.1 * jax.random.normal(keys[8], (Chid,), jnp.float32),
        "v2":   0.5 + jax.random.uniform(keys[9], (Chid,), jnp.float32),
        "fc1w": 0.1 * jax.random.normal(keys[10], (Cse, Chid), jnp.float32),
        "fc1b": 0.1 * jax.random.normal(keys[11], (Cse,), jnp.float32),
        "fc2w": 0.1 * jax.random.normal(keys[12], (Chid, Cse), jnp.float32),
        "fc2b": 0.1 * jax.random.normal(keys[13], (Chid,), jnp.float32),
        "w3":   0.1 * jax.random.normal(keys[14], (Cout, Chid, 1, 1), jnp.float32),
        "g3":   1.0 + 0.1 * jax.random.normal(keys[15], (Cout,), jnp.float32),
        "b3":   0.1 * jax.random.normal(keys[16], (Cout,), jnp.float32),
        "m3":   0.1 * jax.random.normal(keys[17], (Cout,), jnp.float32),
        "v3":   0.5 + jax.random.uniform(keys[18], (Cout,), jnp.float32),
    }

    x = jax.random.normal(keys[19], (B, Cin, H, W), jnp.float32)   # NCHW, like PyTorch

    out = inverted_residual_pallas(x, params, kernel_size=K, stride=stride)
    out = jax.block_until_ready(out)

    ref = inverted_residual_ref(x, params, kernel_size=K, stride=stride)
    ref = jax.block_until_ready(ref)

    assert out.shape == ref.shape, (out.shape, ref.shape)
    # kernel runs explicit single-pass bf16 MXU vs Precision.HIGHEST in the reference:
    # tolerance covers the bf16 mantissa gap at these O(1) magnitudes.
    assert jnp.allclose(out, ref, atol=3e-2, rtol=3e-2), float(jnp.max(jnp.abs(out - ref)))

    print("KERNEL_OK")
</pallas_src>

<mosaic_0001>
module attributes {stable_mosaic.version = 11 : i64} {
  func.func @inverted_residual_kernel(%arg0: i32, %arg1: memref<16x256xf32, #tpu.memory_space<vmem>>, %arg2: memref<64x16xbf16, #tpu.memory_space<vmem>>, %arg3: memref<16x64xf32, #tpu.memory_space<vmem>>, %arg4: memref<64x16xf32, #tpu.memory_space<vmem>>, %arg5: memref<16x64xbf16, #tpu.memory_space<vmem>>, %arg6: memref<64x8xf32, #tpu.memory_space<vmem>>, %arg7: memref<16x256xf32, #tpu.memory_space<vmem>>) attributes {dimension_semantics = [#tpu.dimension_semantics<parallel>], iteration_bounds = array<i64: 1>, scalar_prefetch = 0 : i64, scratch_operands = 0 : i64, tpu.core_type = #tpu.core_type<tc>, window_params = [{transform_indices = @transform_0, window_bounds = array<i64: 16, 256>}, {pipeline_mode = #tpu.pipeline_mode<synchronous>, transform_indices = @transform_1, window_bounds = array<i64: 64, 16>}, {pipeline_mode = #tpu.pipeline_mode<synchronous>, transform_indices = @transform_2, window_bounds = array<i64: 16, 64>}, {pipeline_mode = #tpu.pipeline_mode<synchronous>, transform_indices = @transform_3, window_bounds = array<i64: 64, 16>}, {pipeline_mode = #tpu.pipeline_mode<synchronous>, transform_indices = @transform_4, window_bounds = array<i64: 16, 64>}, {pipeline_mode = #tpu.pipeline_mode<synchronous>, transform_indices = @transform_5, window_bounds = array<i64: 64, 8>}, {transform_indices = @transform_6, window_bounds = array<i64: 16, 256>}]} {
    %c0 = arith.constant 0 : index
    %c0_0 = arith.constant 0 : index
    %0 = vector.load %arg1[%c0, %c0_0] : memref<16x256xf32, #tpu.memory_space<vmem>>, vector<16x256xf32>
    %c0_1 = arith.constant 0 : index
    %c0_2 = arith.constant 0 : index
    %1 = vector.load %arg6[%c0_1, %c0_2] : memref<64x8xf32, #tpu.memory_space<vmem>>, vector<64x8xf32>
    %2 = vector.extract_strided_slice %1 {offsets = [0, 0], sizes = [64, 1], strides = [1, 1]} : vector<64x8xf32> to vector<64x1xf32>
    %3 = vector.extract_strided_slice %1 {offsets = [0, 1], sizes = [64, 1], strides = [1, 1]} : vector<64x8xf32> to vector<64x1xf32>
    %4 = vector.extract_strided_slice %1 {offsets = [0, 2], sizes = [64, 1], strides = [1, 1]} : vector<64x8xf32> to vector<64x1xf32>
    %5 = vector.extract_strided_slice %1 {offsets = [0, 3], sizes = [16, 1], strides = [1, 1]} : vector<64x8xf32> to vector<16x1xf32>
    %6 = vector.extract_strided_slice %1 {offsets = [0, 4], sizes = [16, 1], strides = [1, 1]} : vector<64x8xf32> to vector<16x1xf32>
    %7 = vector.extract_strided_slice %1 {offsets = [0, 5], sizes = [64, 3], strides = [1, 1]} : vector<64x8xf32> to vector<64x3xf32>
    %c0_3 = arith.constant 0 : index
    %c0_4 = arith.constant 0 : index
    %8 = vector.load %arg2[%c0_3, %c0_4] : memref<64x16xbf16, #tpu.memory_space<vmem>>, vector<64x16xbf16>
    %9 = arith.truncf %0 : vector<16x256xf32> to vector<16x256xbf16>
    %cst = arith.constant dense<0.000000e+00> : vector<64x256xf32>
    %10 = tpu.matmul %8, %9, %cst {dimension_numbers = #tpu.dot_dimension_numbers<[1], [0], [0], [1], [0, 0, 1, 1], [], []>} : vector<64x16xbf16>, vector<16x256xbf16>, vector<64x256xf32> -> vector<64x256xf32>
    %11 = vector.broadcast %2 : vector<64x1xf32> to vector<64x256xf32>
    %12 = arith.addf %10, %11 : vector<64x256xf32>
    %cst_5 = arith.constant 3.000000e+00 : f32
    %13 = vector.broadcast %cst_5 : f32 to vector<64x256xf32>
    %14 = arith.addf %12, %13 : vector<64x256xf32>
    %cst_6 = arith.constant 0.000000e+00 : f32
    %cst_7 = arith.constant 6.000000e+00 : f32
    %15 = vector.broadcast %cst_6 : f32 to vector<64x256xf32>
    %16 = arith.maximumf %15, %14 : vector<64x256xf32>
    %17 = vector.broadcast %cst_7 : f32 to vector<64x256xf32>
    %18 = arith.minimumf %17, %16 : vector<64x256xf32>
    %19 = arith.mulf %12, %18 : vector<64x256xf32>
    %cst_8 = arith.constant 0.166666672 : f32
    %20 = vector.broadcast %cst_8 : f32 to vector<64x256xf32>
    %21 = arith.mulf %19, %20 : vector<64x256xf32>
    %22 = tpu.iota {dimensions = array<i32: 1>} : vector<1x256xi32>
    %c16_i32 = arith.constant 16 : i32
    %c0_i32 = arith.constant 0 : i32
    %23 = arith.cmpi eq, %c16_i32, %c0_i32 : i32
    %c1_i32 = arith.constant 1 : i32
    %24 = arith.select %23, %c1_i32, %c16_i32 : i32
    %25 = vector.broadcast %24 : i32 to vector<1x256xi32>
    %26 = arith.remsi %22, %25 : vector<1x256xi32>
    %c0_i32_9 = arith.constant 0 : i32
    %27 = vector.broadcast %c0_i32_9 : i32 to vector<1x256xi32>
    %28 = arith.cmpi ne, %26, %27 : vector<1x256xi32>
    %c0_i32_10 = arith.constant 0 : i32
    %29 = vector.broadcast %c0_i32_10 : i32 to vector<1x256xi32>
    %30 = arith.cmpi slt, %26, %29 : vector<1x256xi32>
    %c0_i32_11 = arith.constant 0 : i32
    %31 = arith.cmpi slt, %24, %c0_i32_11 : i32
    %32 = vector.broadcast %31 : i1 to vector<1x256xi1>
    %33 = vector.broadcast %32 : vector<1x256xi1> to vector<1x256xi1>
    %34 = arith.xori %30, %33 : vector<1x256xi1>
    %35 = arith.andi %34, %28 : vector<1x256xi1>
    %36 = vector.broadcast %24 : i32 to vector<1x256xi32>
    %37 = arith.addi %26, %36 : vector<1x256xi32>
    %38 = arith.select %35, %37, %26 : vector<1x256xi1>, vector<1x256xi32>
    %c1_i32_12 = arith.constant 1 : i32
    %39 = tpu.dynamic_rotate %21 by %c1_i32_12 dim 1 : vector<64x256xf32>, i32 -> vector<64x256xf32>
    %c1_i32_13 = arith.constant 1 : i32
    %40 = vector.broadcast %c1_i32_13 : i32 to vector<1x256xi32>
    %41 = arith.cmpi sge, %38, %40 : vector<1x256xi32>
    %cst_14 = arith.constant 0.000000e+00 : f32
    %42 = vector.shape_cast %41 : vector<1x256xi1> to vector<1x256xi1>
    %43 = vector.broadcast %42 : vector<1x256xi1> to vector<64x256xi1>
    %44 = vector.broadcast %cst_14 : f32 to vector<64x256xf32>
    %45 = arith.select %43, %39, %44 : vector<64x256xi1>, vector<64x256xf32>
    %46 = vector.extract_strided_slice %7 {offsets = [0, 0], sizes = [64, 1], strides = [1, 1]} : vector<64x3xf32> to vector<64x1xf32>
    %47 = vector.broadcast %46 : vector<64x1xf32> to vector<64x256xf32>
    %48 = arith.mulf %45, %47 : vector<64x256xf32>
    %49 = vector.extract_strided_slice %7 {offsets = [0, 1], sizes = [64, 1], strides = [1, 1]} : vector<64x3xf32> to vector<64x1xf32>
    %50 = vector.broadcast %49 : vector<64x1xf32> to vector<64x256xf32>
    %51 = arith.mulf %21, %50 : vector<64x256xf32>
    %52 = arith.addf %48, %51 : vector<64x256xf32>
    %c255_i32 = arith.constant 255 : i32
    %53 = tpu.dynamic_rotate %21 by %c255_i32 dim 1 : vector<64x256xf32>, i32 -> vector<64x256xf32>
    %c15_i32 = arith.constant 15 : i32
    %54 = vector.broadcast %c15_i32 : i32 to vector<1x256xi32>
    %55 = arith.cmpi slt, %38, %54 : vector<1x256xi32>
    %cst_15 = arith.constant 0.000000e+00 : f32
    %56 = vector.shape_cast %55 : vector<1x256xi1> to vector<1x256xi1>
    %57 = vector.broadcast %56 : vector<1x256xi1> to vector<64x256xi1>
    %58 = vector.broadcast %cst_15 : f32 to vector<64x256xf32>
    %59 = arith.select %57, %53, %58 : vector<64x256xi1>, vector<64x256xf32>
    %60 = vector.extract_strided_slice %7 {offsets = [0, 2], sizes = [64, 1], strides = [1, 1]} : vector<64x3xf32> to vector<64x1xf32>
    %61 = vector.broadcast %60 : vector<64x1xf32> to vector<64x256xf32>
    %62 = arith.mulf %59, %61 : vector<64x256xf32>
    %63 = arith.addf %52, %62 : vector<64x256xf32>
    %64 = vector.broadcast %3 : vector<64x1xf32> to vector<64x256xf32>
    %65 = arith.addf %63, %64 : vector<64x256xf32>
    %66 = vector.extract_strided_slice %65 {offsets = [0, 0], sizes = [64, 128], strides = [1, 1]} : vector<64x256xf32> to vector<64x128xf32>
    %cst_16 = arith.constant dense<0.000000e+00> : vector<64xf32>
    %67 = vector.multi_reduction <add>, %66, %cst_16 [1] : vector<64x128xf32> to vector<64xf32>
    %68 = vector.shape_cast %67 : vector<64xf32> to vector<64x1xf32>
    %cst_17 = arith.constant 1.280000e+02 : f32
    %69 = vector.broadcast %cst_17 : f32 to vector<64x1xf32>
    %70 = arith.divf %68, %69 : vector<64x1xf32>
    %71 = vector.extract_strided_slice %65 {offsets = [0, 128], sizes = [64, 128], strides = [1, 1]} : vector<64x256xf32> to vector<64x128xf32>
    %cst_18 = arith.constant dense<0.000000e+00> : vector<64xf32>
    %72 = vector.multi_reduction <add>, %71, %cst_18 [1] : vector<64x128xf32> to vector<64xf32>
    %73 = vector.shape_cast %72 : vector<64xf32> to vector<64x1xf32>
    %cst_19 = arith.constant 1.280000e+02 : f32
    %74 = vector.broadcast %cst_19 : f32 to vector<64x1xf32>
    %75 = arith.divf %73, %74 : vector<64x1xf32>
    %76 = tpu.concatenate %70, %75 in 1 : vector<64x1xf32>, vector<64x1xf32> -> vector<64x2xf32>
    %c0_20 = arith.constant 0 : index
    %c0_21 = arith.constant 0 : index
    %77 = vector.load %arg3[%c0_20, %c0_21] : memref<16x64xf32, #tpu.memory_space<vmem>>, vector<16x64xf32>
    %cst_22 = arith.constant dense<0.000000e+00> : vector<16x2xf32>
    %78 = tpu.matmul %77, %76, %cst_22 {dimension_numbers = #tpu.dot_dimension_numbers<[1], [0], [0], [1], [0, 0, 1, 1], [], []>} : vector<16x64xf32>, vector<64x2xf32>, vector<16x2xf32> -> vector<16x2xf32>
    %79 = vector.broadcast %6 : vector<16x1xf32> to vector<16x2xf32>
    %80 = arith.addf %78, %79 : vector<16x2xf32>
    %cst_23 = arith.constant 0.000000e+00 : f32
    %81 = vector.broadcast %cst_23 : f32 to vector<16x2xf32>
    %82 = arith.maximumf %80, %81 : vector<16x2xf32>
    %c0_24 = arith.constant 0 : index
    %c0_25 = arith.constant 0 : index
    %83 = vector.load %arg4[%c0_24, %c0_25] : memref<64x16xf32, #tpu.memory_space<vmem>>, vector<64x16xf32>
    %cst_26 = arith.constant dense<0.000000e+00> : vector<64x2xf32>
    %84 = tpu.matmul %83, %82, %cst_26 {dimension_numbers = #tpu.dot_dimension_numbers<[1], [0], [0], [1], [0, 0, 1, 1], [], []>} : vector<64x16xf32>, vector<16x2xf32>, vector<64x2xf32> -> vector<64x2xf32>
    %85 = vector.broadcast %4 : vector<64x1xf32> to vector<64x2xf32>
    %86 = arith.addf %84, %85 : vector<64x2xf32>
    %cst_27 = arith.constant 3.000000e+00 : f32
    %87 = vector.broadcast %cst_27 : f32 to vector<64x2xf32>
    %88 = arith.addf %86, %87 : vector<64x2xf32>
    %cst_28 = arith.constant 0.000000e+00 : f32
    %cst_29 = arith.constant 6.000000e+00 : f32
    %89 = vector.broadcast %cst_28 : f32 to vector<64x2xf32>
    %90 = arith.maximumf %89, %88 : vector<64x2xf32>
    %91 = vector.broadcast %cst_29 : f32 to vector<64x2xf32>
    %92 = arith.minimumf %91, %90 : vector<64x2xf32>
    %cst_30 = arith.constant 0.166666672 : f32
    %93 = vector.broadcast %cst_30 : f32 to vector<64x2xf32>
    %94 = arith.mulf %92, %93 : vector<64x2xf32>
    %95 = vector.extract_strided_slice %65 {offsets = [0, 0], sizes = [64, 128], strides = [1, 1]} : vector<64x256xf32> to vector<64x128xf32>
    %96 = vector.extract_strided_slice %94 {offsets = [0, 0], sizes = [64, 1], strides = [1, 1]} : vector<64x2xf32> to vector<64x1xf32>
    %97 = vector.broadcast %96 : vector<64x1xf32> to vector<64x128xf32>
    %98 = arith.mulf %95, %97 : vector<64x128xf32>
    %99 = vector.extract_strided_slice %65 {offsets = [0, 128], sizes = [64, 128], strides = [1, 1]} : vector<64x256xf32> to vector<64x128xf32>
    %100 = vector.extract_strided_slice %94 {offsets = [0, 1], sizes = [64, 1], strides = [1, 1]} : vector<64x2xf32> to vector<64x1xf32>
    %101 = vector.broadcast %100 : vector<64x1xf32> to vector<64x128xf32>
    %102 = arith.mulf %99, %101 : vector<64x128xf32>
    %103 = tpu.concatenate %98, %102 in 1 : vector<64x128xf32>, vector<64x128xf32> -> vector<64x256xf32>
    %cst_31 = arith.constant 3.000000e+00 : f32
    %104 = vector.broadcast %cst_31 : f32 to vector<64x256xf32>
    %105 = arith.addf %103, %104 : vector<64x256xf32>
    %cst_32 = arith.constant 0.000000e+00 : f32
    %cst_33 = arith.constant 6.000000e+00 : f32
    %106 = vector.broadcast %cst_32 : f32 to vector<64x256xf32>
    %107 = arith.maximumf %106, %105 : vector<64x256xf32>
    %108 = vector.broadcast %cst_33 : f32 to vector<64x256xf32>
    %109 = arith.minimumf %108, %107 : vector<64x256xf32>
    %110 = arith.mulf %103, %109 : vector<64x256xf32>
    %cst_34 = arith.constant 0.166666672 : f32
    %111 = vector.broadcast %cst_34 : f32 to vector<64x256xf32>
    %112 = arith.mulf %110, %111 : vector<64x256xf32>
    %c0_35 = arith.constant 0 : index
    %c0_36 = arith.constant 0 : index
    %113 = vector.load %arg5[%c0_35, %c0_36] : memref<16x64xbf16, #tpu.memory_space<vmem>>, vector<16x64xbf16>
    %114 = arith.truncf %112 : vector<64x256xf32> to vector<64x256xbf16>
    %cst_37 = arith.constant dense<0.000000e+00> : vector<16x256xf32>
    %115 = tpu.matmul %113, %114, %cst_37 {dimension_numbers = #tpu.dot_dimension_numbers<[1], [0], [0], [1], [0, 0, 1, 1], [], []>} : vector<16x64xbf16>, vector<64x256xbf16>, vector<16x256xf32> -> vector<16x256xf32>
    %116 = vector.broadcast %5 : vector<16x1xf32> to vector<16x256xf32>
    %117 = arith.addf %115, %116 : vector<16x256xf32>
    %118 = arith.addf %117, %0 : vector<16x256xf32>
    %c0_38 = arith.constant 0 : index
    %c0_39 = arith.constant 0 : index
    %119 = vector.load %arg7[%c0_38, %c0_39] : memref<16x256xf32, #tpu.memory_space<vmem>>, vector<16x256xf32>
    tpu.vector_store %arg7[%c0_38, %c0_39], %118 {strides = array<i32>} : memref<16x256xf32, #tpu.memory_space<vmem>>, vector<16x256xf32>,
    return
  }
  func.func @transform_0(%arg0: i32) -> (i32, i32) {
    %c0_i32 = arith.constant 0 : i32
    %c0_i32_0 = arith.constant 0 : i32
    return %c0_i32, %arg0 : i32, i32
  }
  func.func @transform_1(%arg0: i32) -> (i32, i32) {
    %c0_i32 = arith.constant 0 : i32
    %c0_i32_0 = arith.constant 0 : i32
    %c0_i32_1 = arith.constant 0 : i32
    return %c0_i32, %c0_i32_0 : i32, i32
  }
  func.func @transform_2(%arg0: i32) -> (i32, i32) {
    %c0_i32 = arith.constant 0 : i32
    %c0_i32_0 = arith.constant 0 : i32
    %c0_i32_1 = arith.constant 0 : i32
    return %c0_i32, %c0_i32_0 : i32, i32
  }
  func.func @transform_3(%arg0: i32) -> (i32, i32) {
    %c0_i32 = arith.constant 0 : i32
    %c0_i32_0 = arith.constant 0 : i32
    %c0_i32_1 = arith.constant 0 : i32
    return %c0_i32, %c0_i32_0 : i32, i32
  }
  func.func @transform_4(%arg0: i32) -> (i32, i32) {
    %c0_i32 = arith.constant 0 : i32
    %c0_i32_0 = arith.constant 0 : i32
    %c0_i32_1 = arith.constant 0 : i32
    return %c0_i32, %c0_i32_0 : i32, i32
  }
  func.func @transform_5(%arg0: i32) -> (i32, i32) {
    %c0_i32 = arith.constant 0 : i32
    %c0_i32_0 = arith.constant 0 : i32
    %c0_i32_1 = arith.constant 0 : i32
    return %c0_i32, %c0_i32_0 : i32, i32
  }
  func.func @transform_6(%arg0: i32) -> (i32, i32) {
    %c0_i32 = arith.constant 0 : i32
    %c0_i32_0 = arith.constant 0 : i32
    return %c0_i32, %arg0 : i32, i32
  }
}

</mosaic_0001>

<bundles_post_ra>
// kernel: tpu_custom_call.1
= control target key start
LH: loop header
LB: loop body
LE: loop exit
PB: predicated region body
PF: predicated region fallthrough
CT: control target
= control target key end

     0   :  { %v1280_v3 = vmov 0   ;;  %vm107_vm0 = vcmask 130048   ;;  %s1997_s0 = inlined_call_operand.vmem [shape: f32[16,256], index: 0, kind: input, shape index: {}]   ;;  %s1998_s1 = inlined_call_operand.vmem [shape: bf16[64,16], index: 1, kind: input, shape index: {}]   ;;  %s1999_s2 = inlined_call_operand.vmem [shape: f32[16,64], index: 2, kind: input, shape index: {}]   ;;  %s2000_s3 = inlined_call_operand.vmem [shape: f32[64,16], index: 3, kind: input, shape index: {}]   ;;  %s2001_s4 = inlined_call_operand.vmem [shape: bf16[16,64], index: 4, kind: input, shape index: {}]   ;;  %s2002_s5 = inlined_call_operand.vmem [shape: f32[64,8], index: 5, kind: input, shape index: {}]   ;;  %s2003_s6 = inlined_call_operand.hbm [shape: f32[16,256], index: 6, kind: output, shape index: {}]  }
   0x1   :  { %v1332_v0 = vld [vmem:[%s2002_s5 + $0x38] sm:$0xff]  ;;  %v1337_v1 = vld [vmem:[%s2002_s5 + $0x28] sm:$0xff]  ;;  %1203 = vset.pattern.permute.xlu2 %v1280_v3  ;;  %1202 = vset.pattern.permute.xlu1 %v1280_v3  ;;  %v25_v4 = vld [vmem:[%s1997_s0] sm:$0xff] }
   0x2   :  { %v1342_v2 = vld [vmem:[%s2002_s5 + $0x18] sm:$0xff]  ;;  %v27_v5 = vld [vmem:[%s1997_s0 + $0x10] sm:$0xff]  ;;  %v26_v6 = vld [vmem:[%s1997_s0 + $0x8] sm:$0xff]  ;;  %1201 = vset.pattern.permute.xlu0 %v1280_v3  ;;  %74 = vperm.xlu1 %1202, %v1337_v1  }
   0x3   :  { %v45_v7 = vpack.c.bf16 %v27_v5, %v25_v4  ;;  %v28_v8 = vld [vmem:[%s1997_s0 + $0x18] sm:$0xff]  ;;  %84 = vperm.xlu0 %1201, %v1332_v0   ;;  %64 = vperm.xlu2 %1203, %v1342_v2   ;;  %v1182_v10 = vld [vmem:[%s1998_s1] sm:$0xff] }
   0x4   :  { %v46_v9 = vpack.c.bf16 %v28_v8, %v26_v6 }
   0x5   :  { %127 = vmatpush.bf16.msra.mxu0 %v45_v7 }
   0x6   :  { %11 = vsyncpa [#allocation3], 0  ;;  %156 = vmatpush.bf16.msra.mxu1 %v46_v9  ;;  %v1369_v11 = vld [vmem:[%s2002_s5 + $0x20] sm:$0xff]  ;;  %v35_v12 = vld [vmem:[%s2002_s5 + $0x30] sm:$0xff]  ;;  %v1281_v16 = vmov 6   ;;  %v1282_v18 = vmov 7  }
   0x7   :  { %v1378_v13 = vld [vmem:[%s2002_s5 + $0x10] sm:$0xff]  ;;  %v1385_v14 = vld [vmem:[%s2002_s5] sm:$0xff]  ;;  %v1390_v15 = vld [vmem:[%s2002_s5 + $0x8] sm:$0xff]  ;;  %v1283_v19 = vmov 5   ;;  %v1284_v22 = vmov 1   ;;  %s1286_s29 = smov 1  }
   0x8   :  { %1158 = vmatmul.msk.bf16.vlgmr.msra.gmra.mxu0 %vm107_vm0, %v1182_v10  ;;  %v1183_v17 = vld [vmem:[%s1998_s1 + $0x8] sm:$0xff]  ;;  %v1184_v20 = vld [vmem:[%s1998_s1 + $0x10] sm:$0xff]  ;;  %v1185_v21 = vld [vmem:[%s1998_s1 + $0x18] sm:$0xff]  ;;  %s1285_s1 = smov 127   ;;  %vm706_vm8 = vcmask 7168   ;;  %vm725_vm9 = vcmask 523264  }
   0x9   :  { %1162 = vmatmul.msk.bf16.vlgmr.msra.gmra.mxu1 %vm107_vm0, %v1182_v10  ;;  %s1291_s20 = smov [#allocation2]   ;;  %s1130_s24 = sshll.u32 %s2003_s6, 4  ;;  %s1131_s24 = int_to_ptr.hbm [resolvable:$true] %s1130_s24 }
   0xa   :  { %69 = vperm.xlu1 %1202, %v1369_v11   ;;  %s1128_s21 = sshll.u32 %s1291_s20, 4  ;;  %s1292_s27 = smov 256   ;;  %s1129_s21 = int_to_ptr.vmem [resolvable:$true] %s1128_s21 }
   0xb   :  { %79 = vperm.xlu0 %1201, %v35_v12   ;;  %59 = vperm.xlu2 %1203, %v1378_v13   ;;  %s1293_s28 = smov 16  }
  0x12   :  { %49 = vperm.xlu1 %1202, %v1385_v14  }
  0x13   :  { %1206 = vset.pattern.permute.xlu2 %v1281_v16  ;;  %54 = vperm.xlu0 %1201, %v1390_v15  }
  0x14   :  { %429 = vperm.xlu2 %1206, %v35_v12  }
  0x18   :  { %1159 = vmatmul.msk.bf16.gmra.mxu0 %vm107_vm0, %v1183_v17 }
  0x19   :  { %1163 = vmatmul.msk.bf16.gmra.mxu1 %vm107_vm0, %v1183_v17 }
  0x1a   :  { %1204 = vset.pattern.permute.xlu1 %v1281_v16 }
  0x1b   :  { %433 = vperm.xlu1 %1204, %v1332_v0   ;;  %1209 = vset.pattern.permute.xlu0 %v1281_v16 }
  0x1c   :  { %1207 = vset.pattern.permute.xlu2 %v1282_v18  ;;  %425 = vperm.xlu0 %1209, %v1337_v1  }
  0x1d   :  { %568 = vperm.xlu2 %1207, %v1332_v0  }
  0x23   :  { %1205 = vset.pattern.permute.xlu1 %v1283_v19 }
  0x24   :  { %381 = vperm.xlu1 %1205, %v35_v12   ;;  %1210 = vset.pattern.permute.xlu0 %v1283_v19 }
  0x25   :  { %1208 = vset.pattern.permute.xlu2 %v1283_v19  ;;  %385 = vperm.xlu0 %1210, %v1332_v0  }
  0x26   :  { %377 = vperm.xlu2 %1208, %v1337_v1  }
  0x28   :  { %1160 = vmatmul.msk.bf16.gmra.mxu0 %vm107_vm0, %v1184_v20 }
  0x29   :  { %1164 = vmatmul.msk.bf16.gmra.mxu1 %vm107_vm0, %v1184_v20 }
  0x2c   :  { %1211 = vset.pattern.permute.xlu1 %v1282_v18 }
  0x2d   :  { %564 = vperm.xlu1 %1211, %v35_v12   ;;  %365 = vperm.xlu0 %1210, %v1378_v13  }
  0x2e   :  { %1213 = vset.pattern.permute.xlu2 %v1281_v16 }
  0x2f   :  { %421 = vperm.xlu2 %1213, %v1369_v11  }
  0x35   :  { %1212 = vset.pattern.permute.xlu1 %v1283_v19  ;;  %1217 = vset.pattern.permute.xlu0 %v1284_v22 }
  0x36   :  { %373 = vperm.xlu1 %1212, %v1369_v11   ;;  %632 = vperm.xlu0 %1217, %v1332_v0  }
  0x37   :  { %1214 = vset.pattern.permute.xlu2 %v1282_v18 }
  0x38   :  { %1161 = vmatmul.msk.bf16.gmra.mxu0 %vm107_vm0, %v1185_v21  ;;  %560 = vperm.xlu2 %1214, %v1337_v1  }
  0x39   :  { %1165 = vmatmul.msk.bf16.gmra.mxu1 %vm107_vm0, %v1185_v21 }
  0x3e   :  { %369 = vperm.xlu1 %1212, %v1342_v2   ;;  %628 = vperm.xlu0 %1217, %v35_v12  }
  0x40   :  { %1215 = vset.pattern.permute.xlu2 %v1281_v16 }
  0x41   :  { %417 = vperm.xlu2 %1215, %v1342_v2  }
  0x46   :  { %1218 = vset.pattern.permute.xlu1 %v1281_v16  ;;  %624 = vperm.xlu0 %1217, %v1337_v1  }
  0x47   :  { %413 = vperm.xlu1 %1218, %v1378_v13  }
  0x49   :  { %1216 = vset.pattern.permute.xlu2 %v1282_v18 }
  0x4a   :  { %556 = vperm.xlu2 %1216, %v1369_v11  }
  0x4e   :  { %620 = vperm.xlu0 %1217, %v1369_v11  }
  0x4f   :  { %1219 = vset.pattern.permute.xlu1 %v1283_v19 }
  0x50   :  { %361 = vperm.xlu1 %1219, %v1390_v15  }
  0x52   :  { %552 = vperm.xlu2 %1216, %v1342_v2  }
  0x56   :  { %616 = vperm.xlu0 %1217, %v1342_v2  }
  0x58   :  { %357 = vperm.xlu1 %1219, %v1385_v14  }
  0x5a   :  { %1220 = vset.pattern.permute.xlu2 %v1281_v16 }
  0x5b   :  { %409 = vperm.xlu2 %1220, %v1390_v15  }
  0x5d   :  { %v1429_v23 = vpop.permute.xlu2 %64 }
  0x60   :  { %1224 = vset.pattern.permute.xlu1 %v1282_v18 }
  0x61   :  { %540 = vperm.xlu1 %1224, %v1385_v14  }
  0x63   :  { %1221 = vset.pattern.permute.xlu2 %v1282_v18 }
  0x64   :  { %548 = vperm.xlu2 %1221, %v1378_v13  }
  0x65   :  { %v60_v24 = vpop.permute.xlu2 %59 }
  0x69   :  { %1226 = vset.pattern.permute.xlu1 %v1284_v22 }
  0x6c   :  { %1222 = vset.pattern.permute.xlu2 %v1281_v16 }
  0x6d   :  { %405 = vperm.xlu2 %1222, %v1385_v14  }
  0x6e   :  { %v1437_v25 = vpop.permute.xlu2 %429 }
  0x74   :  { %v1439_v26 = vpop.permute.xlu1 %74 }
  0x75   :  { %1223 = vset.pattern.permute.xlu2 %v1282_v18  ;;  %v1444_v28 = vpop.permute.xlu0 %84 }
  0x76   :  { %544 = vperm.xlu2 %1223, %v1390_v15  }
  0x77   :  { %v1442_v27 = vpop.permute.xlu2 %568 }
  0x7c   :  { %v1446_v29 = vpop.permute.xlu1 %69 }
  0x7d   :  { %v1452_v31 = vpop.permute.xlu0 %79 }
  0x7e   :  { %1225 = vset.pattern.permute.xlu2 %v1284_v22 }
  0x7f   :  { %612 = vperm.xlu2 %1225, %v1378_v13  }
  0x80   :  { %v1450_v30 = vpop.permute.xlu2 %377 }
  0x84   :  { %v50_v33 = vpop.permute.xlu1 %49 }
  0x85   :  { %v129_v32 = vpop.f32.mrf.mxu0  ;;  %v55_v43 = vpop.permute.xlu0 %54 }
  0x86   :  { %v158_v34 = vpop.f32.mrf.mxu1  ;;  %v130_v35 = vadd.f32 %v129_v32, %v50_v33 }
  0x87   :  { %v159_v36 = vadd.f32 %v158_v34, %v50_v33 }
  0x88   :  { %v178_v37 = vadd.f32 3.0, %v130_v35 }
  0x89   :  { %v179_v38 = vadd.f32 3.0, %v159_v36  ;;  %v1454_v40 = vpop.permute.xlu2 %421 }
  0x8a   :  { %v194_v39 = vmax.f32 %v178_v37, 0.0 }
  0x8b   :  { %v195_v41 = vmax.f32 %v179_v38, 0.0 }
  0x8c   :  { %v210_v42 = vmin.f32 %v194_v39, 6.0 }
  0x8d   :  { %v211_v44 = vmin.f32 %v195_v41, 6.0  ;;  %v131_v45 = vpop.f32.mrf.mxu0  ;;  %v1456_v49 = vpop.permute.xlu1 %433 }
  0x8e   :  { %v226_v46 = vmul.f32 %v210_v42, %v130_v35  ;;  %v132_v47 = vadd.f32 %v131_v45, %v55_v43  ;;  %v160_v48 = vpop.f32.mrf.mxu1 }
  0x8f   :  { %v227_v50 = vmul.f32 %v211_v44, %v159_v36  ;;  %v161_v51 = vadd.f32 %v160_v48, %v55_v43 }
  0x90   :  { %v180_v52 = vadd.f32 3.0, %v132_v47  ;;  %v1458_v53 = vmul.f32 0.16666667, %v226_v46 }
  0x91   :  { %v181_v54 = vadd.f32 3.0, %v161_v51  ;;  %v1460_v55 = vmul.f32 0.16666667, %v227_v50 }
  0x92   :  { %v196_v56 = vmax.f32 %v180_v52, 0.0  ;;  %468 = vrot.lane.b32.xlu0 %v1458_v53, %s1285_s1  ;;  %285 = vrot.lane.b32.xlu1 %v1458_v53, %s1286_s29  ;;  %v1468_v58 = vpop.permute.xlu2 %560 }
  0x93   :  { %v197_v57 = vmax.f32 %v181_v54, 0.0  ;;  %301 = vrot.lane.b32.xlu2 %v1460_v55, %s1286_s29 }
  0x94   :  { %v212_v59 = vmin.f32 %v196_v56, 6.0 }
  0x95   :  { %v213_v60 = vmin.f32 %v197_v57, 6.0  ;;  %v134_v61 = vpop.f32.mrf.mxu0 }
  0x96   :  { %v228_v62 = vmul.f32 %v212_v59, %v132_v47  ;;  %v135_v63 = vadd.f32 %v134_v61, %v60_v24  ;;  %v163_v0 = vpop.f32.mrf.mxu1  ;;  %v1470_v4 = vpop.permute.xlu1 %381 }
  0x97   :  { %v229_v1 = vmul.f32 %v213_v60, %v161_v51  ;;  %v164_v2 = vadd.f32 %v163_v0, %v60_v24 }
  0x98   :  { %v1472_v5 = vmul.f32 0.16666667, %v228_v62  ;;  %v182_v7 = vadd.f32 3.0, %v135_v63 }
  0x99   :  { %v1474_v6 = vmul.f32 0.16666667, %v229_v1  ;;  %v183_v8 = vadd.f32 3.0, %v164_v2 }
  0x9a   :  { %470 = vrot.lane.b32.xlu0 %v1472_v5, %s1285_s1  ;;  %484 = vrot.lane.b32.xlu1 %v1460_v55, %s1285_s1  ;;  %v198_v11 = vmax.f32 %v182_v7, 0.0 }
  0x9b   :  { %v199_v9 = vmax.f32 %v183_v8, 0.0  ;;  %303 = vrot.lane.b32.xlu2 %v1474_v6, %s1286_s29  ;;  %v418_v10 = vpop.permute.xlu2 %417 }
  0x9c   :  { %v214_v24 = vmin.f32 %v198_v11, 6.0 }
  0x9d   :  { %v215_v12 = vmin.f32 %v199_v9, 6.0  ;;  %v136_v13 = vpop.f32.mrf.mxu0 }
  0x9e   :  { %v137_v16 = vadd.f32 %v136_v13, %v1429_v23  ;;  %v165_v17 = vpop.f32.mrf.mxu1  ;;  %v230_v37 = vmul.f32 %v214_v24, %v135_v63 }
  0x9f   :  { %v231_v18 = vmul.f32 %v215_v12, %v164_v2  ;;  %v166_v19 = vadd.f32 %v165_v17, %v1429_v23  ;;  %v1484_v21 = vpop.permute.xlu1 %564 }
  0xa0   :  { %v184_v20 = vadd.f32 3.0, %v137_v16  ;;  %v246_v48 = vmul.f32 0.16666667, %v230_v37 }
  0xa1   :  { %v1486_v32 = vmul.f32 0.16666667, %v231_v18  ;;  %v185_v33 = vadd.f32 3.0, %v166_v19 }
  0xa2   :  { %v200_v34 = vmax.f32 %v184_v20, 0.0  ;;  %287 = vrot.lane.b32.xlu1 %v1472_v5, %s1286_s29 }
  0xa3   :  { %v201_v35 = vmax.f32 %v185_v33, 0.0  ;;  %305 = vrot.lane.b32.xlu2 %v1486_v32, %s1286_s29 }
  0xa4   :  { %v216_v36 = vmin.f32 %v200_v34, 6.0  ;;  %v1492_v23 = vpop.permute.xlu2 %556 }
  0xa5   :  { %v217_v38 = vmin.f32 %v201_v35, 6.0  ;;  %v139_v39 = vpop.f32.mrf.mxu0 }
  0xa6   :  { %v232_v41 = vmul.f32 %v216_v36, %v137_v16  ;;  %v140_v42 = vadd.f32 %v139_v39, %v1446_v29  ;;  %v168_v43 = vpop.f32.mrf.mxu1  ;;  %v426_v39 = vpop.permute.xlu0 %425 }
  0xa7   :  { %v233_v44 = vmul.f32 %v217_v38, %v166_v19  ;;  %v169_v45 = vadd.f32 %v168_v43, %v1446_v29 }
  0xa8   :  { %v248_v46 = vmul.f32 0.16666667, %v232_v41  ;;  %v186_v47 = vadd.f32 3.0, %v140_v42  ;;  %v1498_v52 = vpop.permute.xlu1 %373 }
  0xa9   :  { %v1496_v50 = vmul.f32 0.16666667, %v233_v44  ;;  %v187_v51 = vadd.f32 3.0, %v169_v45 }
  0xaa   :  { %v1500_v54 = vmul.f32 %v418_v10, %v248_v46  ;;  %v202_v56 = vmax.f32 %v186_v47, 0.0  ;;  %486 = vrot.lane.b32.xlu1 %v1474_v6, %s1285_s1 }
  0xab   :  { %v1505_v57 = vmul.f32 %v418_v10, %v1496_v50  ;;  %v203_v59 = vmax.f32 %v187_v51, 0.0  ;;  %307 = vrot.lane.b32.xlu0 %v1496_v50, %s1286_s29  ;;  %472 = vrot.lane.b32.xlu2 %v246_v48, %s1285_s1 }
  0xac   :  { %v218_v29 = vmin.f32 %v202_v56, 6.0  ;;  %v1510_v62 = vpop.permute.xlu2 %552 }
  0xad   :  { %v219_v60 = vmin.f32 %v203_v59, 6.0  ;;  %v141_v61 = vpop.f32.mrf.mxu0 }
  0xae   :  { %v234_v63 = vmul.f32 %v218_v29, %v140_v42  ;;  %v142_v0 = vadd.f32 %v141_v61, %v1439_v26  ;;  %v170_v1 = vpop.f32.mrf.mxu1 }
  0xaf   :  { %v235_v2 = vmul.f32 %v219_v60, %v169_v45  ;;  %v171_v7 = vadd.f32 %v170_v1, %v1439_v26 }
  0xb0   :  { %v250_v8 = vmul.f32 0.16666667, %v234_v63  ;;  %v188_v9 = vadd.f32 3.0, %v142_v0  ;;  %v1516_v12 = vpop.permute.xlu1 %369 }
  0xb1   :  { %v1514_v10 = vmul.f32 0.16666667, %v235_v2  ;;  %v189_v11 = vadd.f32 3.0, %v171_v7 }
  0xb2   :  { %v204_v13 = vmax.f32 %v188_v9, 0.0  ;;  %289 = vrot.lane.b32.xlu1 %v246_v48, %s1286_s29  ;;  %v1520_v16 = vmul.f32 %v1454_v40, %v250_v8 }
  0xb3   :  { %v205_v17 = vmax.f32 %v189_v11, 0.0  ;;  %474 = vrot.lane.b32.xlu0 %v248_v46, %s1285_s1  ;;  %291 = vrot.lane.b32.xlu2 %v248_v46, %s1286_s29  ;;  %v1526_v26 = vmul.f32 %v1454_v40, %v1514_v10 }
  0xb4   :  { %v220_v18 = vmin.f32 %v204_v13, 6.0  ;;  %v1557_v13 = vpop.permute.xlu0 %385 }
  0xb5   :  { %v221_v19 = vmin.f32 %v205_v17, 6.0  ;;  %v144_v20 = vpop.f32.mrf.mxu0  ;;  %v410_v34 = vpop.permute.xlu2 %409 }
  0xb6   :  { %v236_v24 = vmul.f32 %v220_v18, %v142_v0  ;;  %v173_v33 = vpop.f32.mrf.mxu1  ;;  %v1530_v37 = vmul.f32 %v410_v34, %v1472_v5  ;;  %v1533_v38 = vmul.f32 %v410_v34, %v1474_v6  ;;  %v145_v6 = vadd.f32 %v144_v20, %v1452_v31 }
  0xb7   :  { %v237_v35 = vmul.f32 %v221_v19, %v171_v7  ;;  %v174_v36 = vadd.f32 %v173_v33, %v1452_v31 }
  0xb8   :  { %v252_v41 = vmul.f32 0.16666667, %v236_v24  ;;  %v190_v61 = vadd.f32 3.0, %v145_v6 }
  0xb9   :  { %v253_v42 = vmul.f32 0.16666667, %v237_v35  ;;  %v191_v40 = vadd.f32 3.0, %v174_v36  ;;  %v414_v44 = vpop.permute.xlu1 %413 }
  0xba   :  { %v1535_v43 = vmul.f32 %v426_v39, %v252_v41  ;;  %488 = vrot.lane.b32.xlu1 %v1486_v32, %s1285_s1  ;;  %v1542_v46 = vmul.f32 %v414_v44, %v246_v48  ;;  %v1545_v5 = vmul.f32 %v414_v44, %v1486_v32  ;;  %v206_v31 = vmax.f32 %v190_v61, 0.0 }
  0xbb   :  { %v1539_v45 = vmul.f32 %v426_v39, %v253_v42  ;;  %293 = vrot.lane.b32.xlu0 %v250_v8, %s1286_s29  ;;  %295 = vrot.lane.b32.xlu2 %v252_v41, %s1286_s29  ;;  %v207_v47 = vmax.f32 %v191_v40, 0.0  ;;  %v258_v40 = vlaneseq }
  0xbc   :  { %v222_v17 = vmin.f32 %v206_v31, 6.0 }
  0xbd   :  { %v146_v51 = vpop.f32.mrf.mxu0  ;;  %v223_v48 = vmin.f32 %v207_v47, 6.0  ;;  %v1598_v44 = vand.u32 127, %v258_v40 }
  0xbe   :  { %v147_v56 = vadd.f32 %v146_v51, %v1444_v28  ;;  %v175_v59 = vpop.f32.mrf.mxu1  ;;  %v1551_v60 = vpop.permute.xlu2 %548  ;;  %v238_v35 = vmul.f32 %v222_v17, %v145_v6 }
  0xbf   :  { %v176_v29 = vadd.f32 %v175_v59, %v1444_v28  ;;  %v239_v7 = vmul.f32 %v223_v48, %v174_v36  ;;  %v265_v59 = vand.u32 15, %v1598_v44  ;;  %vm317_vm1 = vcmp.lt.s32.totalorder %v1598_v44, 1 }
  0xc0   :  { %v192_v63 = vadd.f32 3.0, %v147_v56  ;;  %v1574_v36 = vmul.f32 0.16666667, %v238_v35  ;;  %vm500_vm4 = vcmp.lt.s32.totalorder %v1598_v44, 127 }
  0xc1   :  { %v193_v0 = vadd.f32 3.0, %v176_v29  ;;  %v1559_v20 = vmul.f32 0.16666667, %v239_v7  ;;  %vm1610_vm2 = vcmp.ge.s32.totalorder %v265_v59, 1  ;;  %vm1627_vm5 = vcmp.lt.s32.totalorder %v265_v59, 15 }
  0xc2   :  { %v208_v1 = vmax.f32 %v192_v63, 0.0  ;;  %490 = vrot.lane.b32.xlu1 %v1496_v50, %s1285_s1 }
  0xc3   :  { %v209_v32 = vmax.f32 %v193_v0, 0.0  ;;  %476 = vrot.lane.b32.xlu0 %v250_v8, %s1285_s1  ;;  %494 = vrot.lane.b32.xlu2 %v253_v42, %s1285_s1 }
  0xc4   :  { %v224_v2 = vmin.f32 %v208_v1, 6.0 }
  0xc5   :  { %v225_v9 = vmin.f32 %v209_v32, 6.0 }
  0xc6   :  { %v240_v28 = vmul.f32 %v224_v2, %v147_v56  ;;  %v260_v56 = vadd.s32 128, %v1598_v44 }
  0xc7   :  { %v241_v11 = vmul.f32 %v225_v9, %v176_v29  ;;  %v406_v19 = vpop.permute.xlu2 %405 }
  0xc8   :  { %v256_v18 = vmul.f32 0.16666667, %v240_v28  ;;  %v436_v50 = vmul.f32 %v406_v19, %v1458_v53  ;;  %v437_v8 = vmul.f32 %v406_v19, %v1460_v55  ;;  %v1576_v53 = vpop.permute.xlu0 %365  ;;  %v272_v29 = vand.u32 15, %v260_v56 }
  0xc9   :  { %v257_v24 = vmul.f32 0.16666667, %v241_v11 }
  0xca   :  { %309 = vrot.lane.b32.xlu1 %v1514_v10, %s1286_s29  ;;  %v1566_v33 = vmul.f32 %v1456_v49, %v256_v18  ;;  %vm1614_vm3 = vcmp.ge.s32.totalorder %v272_v29, 1  ;;  %vm1631_vm6 = vcmp.lt.s32.totalorder %v272_v29, 15 }
  0xcb   :  { %311 = vrot.lane.b32.xlu0 %v253_v42, %s1286_s29  ;;  %313 = vrot.lane.b32.xlu2 %v1559_v20, %s1286_s29  ;;  %v1572_v34 = vmul.f32 %v1456_v49, %v257_v24 }
  0xd0   :  { %v1585_v55 = vpop.permute.xlu0 %632 }
  0xd2   :  { %492 = vrot.lane.b32.xlu1 %v1514_v10, %s1285_s1  ;;  %v362_v10 = vpop.permute.xlu1 %361 }
  0xd3   :  { %480 = vrot.lane.b32.xlu0 %v1574_v36, %s1285_s1  ;;  %299 = vrot.lane.b32.xlu2 %v256_v18, %s1286_s29 }
  0xd8   :  { %v1591_v49 = vpop.permute.xlu0 %628 }
  0xda   :  { %478 = vrot.lane.b32.xlu1 %v252_v41, %s1285_s1  ;;  %v545_v41 = vpop.permute.xlu2 %544  ;;  %v358_v42 = vpop.permute.xlu1 %357 }
  0xdb   :  { %315 = vrot.lane.b32.xlu0 %v257_v24, %s1286_s29  ;;  %482 = vrot.lane.b32.xlu2 %v256_v18, %s1285_s1 }
  0xe0   :  { %v1595_v39 = vpop.permute.xlu0 %624 }
  0xe2   :  { %297 = vrot.lane.b32.xlu1 %v1574_v36, %s1286_s29  ;;  %v1602_v47 = vpop.permute.xlu2 %612  ;;  %v541_v51 = vpop.permute.xlu1 %540 }
  0xe3   :  { %608 = vperm.xlu0 %1217, %v1390_v15  }
  0xe8   :  { %v1600_v6 = vpop.permute.xlu0 %620 }
  0xea   :  { %496 = vrot.lane.b32.xlu1 %v1559_v20, %s1285_s1 }
  0xed   :  { %v302_v0 = vpop.permute.xlu2 %301 }
  0xf0   :  { %v1608_v61 = vpop.permute.xlu0 %616 }
  0xf2   :  { %498 = vrot.lane.b32.xlu1 %v257_v24, %s1285_s1 }
  0xfa   :  { %604 = vperm.xlu1 %1226, %v1385_v14  }
 0x104   :  { %v286_v1 = vpop.permute.xlu1 %285  ;;  %v469_v18 = vpop.permute.xlu0 %468 }
 0x105   :  { %v318_v32 = vsel %vm317_vm1, %v286_v1, %v302_v0  ;;  %v326_v31 = vsel %vm317_vm1, %v302_v0, %v286_v1 }
 0x106   :  { %v340_v2 = vsel %vm1610_vm2, %v326_v31, 0.0  ;;  %v341_v7 = vsel %vm1614_vm3, %v318_v32, 0.0 }
 0x107   :  { %v388_v9 = vmul.f32 %v358_v42, %v340_v2  ;;  %v389_v28 = vmul.f32 %v358_v42, %v341_v7 }
 0x109   :  { %v453_v11 = vadd.f32 %v437_v8, %v389_v28  ;;  %v452_v17 = vadd.f32 %v436_v50, %v388_v9  ;;  %v304_v8 = vpop.permute.xlu2 %303 }
 0x10c   :  { %v485_v35 = vpop.permute.xlu1 %484  ;;  %v471_v31 = vpop.permute.xlu0 %470 }
 0x10d   :  { %v501_v40 = vsel %vm500_vm4, %v469_v18, %v485_v35  ;;  %v509_v42 = vsel %vm500_vm4, %v485_v35, %v469_v18 }
 0x10e   :  { %v523_v50 = vsel %vm1627_vm5, %v501_v40, 0.0  ;;  %v524_v56 = vsel %vm1631_vm6, %v509_v42, 0.0 }
 0x10f   :  { %v571_v59 = vmul.f32 %v541_v51, %v523_v50  ;;  %v572_v0 = vmul.f32 %v541_v51, %v524_v56 }
 0x111   :  { %v1643_v29 = vadd.f32 %v572_v0, %v453_v11  ;;  %v1645_v1 = vadd.f32 %v571_v59, %v452_v17  ;;  %v306_v11 = vpop.permute.xlu2 %305 }
 0x114   :  { %v288_v32 = vpop.permute.xlu1 %287 }
 0x115   :  { %v319_v2 = vsel %vm317_vm1, %v288_v32, %v304_v8  ;;  %v327_v7 = vsel %vm317_vm1, %v304_v8, %v288_v32 }
 0x116   :  { %v342_v9 = vsel %vm1610_vm2, %v327_v7, 0.0  ;;  %v343_v28 = vsel %vm1614_vm3, %v319_v2, 0.0 }
 0x117   :  { %v390_v18 = vmul.f32 %v362_v10, %v342_v9  ;;  %v391_v51 = vmul.f32 %v362_v10, %v343_v28 }
 0x119   :  { %v454_v17 = vadd.f32 %v1530_v37, %v390_v18  ;;  %v455_v35 = vadd.f32 %v1533_v38, %v391_v51  ;;  %v473_v38 = vpop.permute.xlu2 %472 }
 0x11c   :  { %v487_v40 = vpop.permute.xlu1 %486 }
 0x11d   :  { %v308_v42 = vpop.permute.xlu0 %307  ;;  %v502_v50 = vsel %vm500_vm4, %v471_v31, %v487_v40  ;;  %v510_v8 = vsel %vm500_vm4, %v487_v40, %v471_v31 }
 0x11e   :  { %v525_v56 = vsel %vm1627_vm5, %v502_v50, 0.0  ;;  %v526_v59 = vsel %vm1631_vm6, %v510_v8, 0.0 }
 0x11f   :  { %v573_v10 = vmul.f32 %v545_v41, %v525_v56  ;;  %v574_v0 = vmul.f32 %v545_v41, %v526_v59 }
 0x121   :  { %v1665_v32 = vadd.f32 %v573_v10, %v454_v17  ;;  %v1667_v37 = vadd.f32 %v574_v0, %v455_v35  ;;  %v292_v40 = vpop.permute.xlu2 %291 }
 0x122   :  { %v321_v8 = vsel %vm317_vm1, %v292_v40, %v308_v42 }
 0x124   :  { %v290_v2 = vpop.permute.xlu1 %289 }
 0x125   :  { %v475_v7 = vpop.permute.xlu0 %474  ;;  %v320_v9 = vsel %vm317_vm1, %v290_v2, %v306_v11  ;;  %v328_v31 = vsel %vm317_vm1, %v306_v11, %v290_v2  ;;  %v329_v11 = vsel %vm317_vm1, %v308_v42, %v292_v40  ;;  %v347_v2 = vsel %vm1614_vm3, %v321_v8, 0.0 }
 0x126   :  { %v344_v28 = vsel %vm1610_vm2, %v328_v31, 0.0  ;;  %v345_v18 = vsel %vm1614_vm3, %v320_v9, 0.0  ;;  %v346_v42 = vsel %vm1610_vm2, %v329_v11, 0.0 }
 0x127   :  { %v392_v41 = vmul.f32 %v1576_v53, %v344_v28  ;;  %v393_v51 = vmul.f32 %v1576_v53, %v345_v18  ;;  %v394_v31 = vmul.f32 %v1516_v12, %v346_v42  ;;  %v395_v28 = vmul.f32 %v1516_v12, %v347_v2 }
 0x129   :  { %v457_v17 = vadd.f32 %v1545_v5, %v393_v51  ;;  %v456_v35 = vadd.f32 %v1542_v46, %v392_v41  ;;  %v458_v12 = vadd.f32 %v1500_v54, %v394_v31 }
 0x12c   :  { %v489_v50 = vpop.permute.xlu1 %488 }
 0x12d   :  { %v503_v56 = vsel %vm500_vm4, %v473_v38, %v489_v50  ;;  %v511_v59 = vsel %vm500_vm4, %v489_v50, %v473_v38  ;;  %v294_v10 = vpop.permute.xlu0 %293  ;;  %v459_v50 = vadd.f32 %v1505_v57, %v395_v28 }
 0x12e   :  { %v527_v5 = vsel %vm1627_vm5, %v503_v56, 0.0  ;;  %v528_v46 = vsel %vm1631_vm6, %v511_v59, 0.0 }
 0x12f   :  { %v575_v53 = vmul.f32 %v1551_v60, %v527_v5  ;;  %v576_v0 = vmul.f32 %v1551_v60, %v528_v46  ;;  %v296_v5 = vpop.permute.xlu2 %295 }
 0x131   :  { %v1699_v9 = vadd.f32 %v576_v0, %v457_v17  ;;  %v1701_v38 = vadd.f32 %v575_v53, %v456_v35 }
 0x134   :  { %v491_v18 = vpop.permute.xlu1 %490 }
 0x135   :  { %v504_v41 = vsel %vm500_vm4, %v475_v7, %v491_v18  ;;  %v512_v60 = vsel %vm500_vm4, %v491_v18, %v475_v7  ;;  %v477_v8 = vpop.permute.xlu0 %476 }
 0x136   :  { %v529_v51 = vsel %vm1627_vm5, %v504_v41, 0.0  ;;  %v530_v17 = vsel %vm1631_vm6, %v512_v60, 0.0 }
 0x137   :  { %v577_v35 = vmul.f32 %v1510_v62, %v529_v51  ;;  %v578_v40 = vmul.f32 %v1510_v62, %v530_v17  ;;  %v495_v41 = vpop.permute.xlu2 %494 }
 0x139   :  { %v594_v11 = vadd.f32 %v578_v40, %v459_v50  ;;  %v593_v56 = vadd.f32 %v577_v35, %v458_v12 }
 0x13b   :  { %v1718_v59 = vadd.f32 %v1608_v61, %v594_v11  ;;  %v1721_v7 = vadd.f32 %v1608_v61, %v593_v56 }
 0x13c   :  { %v310_v46 = vpop.permute.xlu1 %309 }
 0x13d   :  { %v322_v53 = vsel %vm317_vm1, %v294_v10, %v310_v46  ;;  %v330_v62 = vsel %vm317_vm1, %v310_v46, %v294_v10  ;;  %688 = vadd.xlane.f32.xlu1 %v1718_v59  ;;  %657 = vadd.xlane.f32.xlu0 %v1721_v7  ;;  %v312_v61 = vpop.permute.xlu0 %311 }
 0x13e   :  { %v348_v54 = vsel %vm1610_vm2, %v330_v62, 0.0  ;;  %v349_v57 = vsel %vm1614_vm3, %v322_v53, 0.0  ;;  %v323_v31 = vsel %vm317_vm1, %v296_v5, %v312_v61  ;;  %v331_v10 = vsel %vm317_vm1, %v312_v61, %v296_v5 }
 0x13f   :  { %v396_v0 = vmul.f32 %v1498_v52, %v348_v54  ;;  %v397_v42 = vmul.f32 %v1498_v52, %v349_v57  ;;  %v350_v50 = vsel %vm1610_vm2, %v331_v10, 0.0  ;;  %v351_v12 = vsel %vm1614_vm3, %v323_v31, 0.0 }
 0x140   :  { %v398_v56 = vmul.f32 %v1450_v30, %v350_v50  ;;  %v399_v5 = vmul.f32 %v1450_v30, %v351_v12 }
 0x141   :  { %v461_v35 = vadd.f32 %v1526_v26, %v397_v42  ;;  %v460_v40 = vadd.f32 %v1520_v16, %v396_v0  ;;  %v314_v0 = vpop.permute.xlu2 %313 }
 0x142   :  { %v463_v57 = vadd.f32 %v1539_v45, %v399_v5  ;;  %v462_v61 = vadd.f32 %v1535_v43, %v398_v56 }
 0x144   :  { %v493_v2 = vpop.permute.xlu1 %492 }
 0x145   :  { %v505_v28 = vsel %vm500_vm4, %v477_v8, %v493_v2  ;;  %v513_v18 = vsel %vm500_vm4, %v493_v2, %v477_v8  ;;  %v481_v42 = vpop.permute.xlu0 %480 }
 0x146   :  { %v531_v60 = vsel %vm1627_vm5, %v505_v28, 0.0  ;;  %v532_v52 = vsel %vm1631_vm6, %v513_v18, 0.0 }
 0x147   :  { %v579_v51 = vmul.f32 %v1492_v23, %v531_v60  ;;  %v580_v17 = vmul.f32 %v1492_v23, %v532_v52 }
 0x149   :  { %v596_v8 = vadd.f32 %v580_v17, %v461_v35  ;;  %v595_v11 = vadd.f32 %v579_v51, %v460_v40  ;;  %v300_v60 = vpop.permute.xlu2 %299  ;;  %v449_v35 = vmul.f32 %v1437_v25, %v1559_v20  ;;  %v448_v40 = vmul.f32 %v1437_v25, %v1574_v36 }
 0x14b   :  { %v1758_v46 = vadd.f32 %v1600_v6, %v596_v8  ;;  %v1761_v23 = vadd.f32 %v1600_v6, %v595_v11 }
 0x14c   :  { %v479_v26 = vpop.permute.xlu1 %478 }
 0x14d   :  { %v506_v16 = vsel %vm500_vm4, %v479_v26, %v495_v41  ;;  %v514_v53 = vsel %vm500_vm4, %v495_v41, %v479_v26  ;;  %690 = vadd.xlane.f32.xlu2 %v1758_v46  ;;  %659 = vadd.xlane.f32.xlu1 %v1761_v23 }
 0x14e   :  { %v533_v30 = vsel %vm1627_vm5, %v506_v16, 0.0  ;;  %v534_v62 = vsel %vm1631_vm6, %v514_v53, 0.0 }
 0x14f   :  { %v581_v6 = vmul.f32 %v1468_v58, %v533_v30  ;;  %v582_v54 = vmul.f32 %v1468_v58, %v534_v62 }
 0x151   :  { %v598_v2 = vadd.f32 %v582_v54, %v463_v57  ;;  %v597_v31 = vadd.f32 %v581_v6, %v462_v61 }
 0x153   :  { %v1778_v10 = vadd.f32 %v1595_v39, %v598_v2  ;;  %v1781_v28 = vadd.f32 %v1595_v39, %v597_v31  ;;  %v316_v39 = vpop.permute.xlu0 %315 }
 0x154   :  { %v298_v18 = vpop.permute.xlu1 %297  ;;  %v325_v50 = vsel %vm317_vm1, %v300_v60, %v316_v39  ;;  %v333_v12 = vsel %vm317_vm1, %v316_v39, %v300_v60 }
 0x155   :  { %v324_v41 = vsel %vm317_vm1, %v298_v18, %v314_v0  ;;  %v332_v58 = vsel %vm317_vm1, %v314_v0, %v298_v18  ;;  %692 = vadd.xlane.f32.xlu0 %v1778_v10  ;;  %661 = vadd.xlane.f32.xlu2 %v1781_v28  ;;  %v354_v26 = vsel %vm1610_vm2, %v333_v12, 0.0  ;;  %v355_v16 = vsel %vm1614_vm3, %v325_v50, 0.0 }
 0x156   :  { %v352_v43 = vsel %vm1610_vm2, %v332_v58, 0.0  ;;  %v353_v45 = vsel %vm1614_vm3, %v324_v41, 0.0  ;;  %v402_v62 = vmul.f32 %v1557_v13, %v354_v26  ;;  %v403_v6 = vmul.f32 %v1557_v13, %v355_v16 }
 0x157   :  { %v400_v52 = vmul.f32 %v1470_v4, %v352_v43  ;;  %v401_v51 = vmul.f32 %v1470_v4, %v353_v45 }
 0x158   :  { %v467_v2 = vadd.f32 %v1572_v34, %v403_v6  ;;  %v466_v31 = vadd.f32 %v1566_v33, %v402_v62  ;;  %v1853_v33 = vadd.f32 %v1602_v47, %v1699_v9  ;;  %v1287_v9 = vmov 128.0  }
 0x159   :  { %v465_v56 = vadd.f32 %v449_v35, %v401_v51  ;;  %v464_v5 = vadd.f32 %v448_v40, %v400_v52  ;;  %1240 = vrcp.f32 %v1287_v9  ;;  %v715_v9 = vld [vmem:[%s1999_s2] sm:$0xff] }
 0x15b   :  { %v609_v44 = vpop.permute.xlu0 %608 }
 0x15c   :  { %v497_v17 = vpop.permute.xlu1 %496  ;;  %v1840_v58 = vadd.f32 %v609_v44, %v1665_v32  ;;  %v1860_v32 = vadd.f32 %v1602_v47, %v1701_v38  ;;  %v1869_v43 = vadd.f32 %v609_v44, %v1667_v37 }
 0x15d   :  { %v507_v8 = vsel %vm500_vm4, %v481_v42, %v497_v17  ;;  %v515_v11 = vsel %vm500_vm4, %v497_v17, %v481_v42 }
 0x15e   :  { %v535_v4 = vsel %vm1627_vm5, %v507_v8, 0.0  ;;  %v536_v20 = vsel %vm1631_vm6, %v515_v11, 0.0 }
 0x15f   :  { %v583_v25 = vmul.f32 %v1484_v21, %v535_v4  ;;  %v584_v36 = vmul.f32 %v1484_v21, %v536_v20  ;;  %v483_v21 = vpop.permute.xlu2 %482  ;;  %v1241_v47 = vpop.eup %1240  ;;  %v1288_v4 = vmov 4  }
 0x160   :  { %v668_v45 = vmul.f32 128.0, %v1241_v47  ;;  %vm672_vm7 = vweird.f32 %v1241_v47  ;;  %1228 = vset.pattern.permute.xlu0 %v1288_v4  ;;  %1227 = vset.pattern.permute.xlu2 %v1288_v4  ;;  %v1919_v4 = vld [vmem:[%s2002_s5 + $0x8] sm:$0xff] }
 0x161   :  { %v600_v53 = vadd.f32 %v584_v36, %v465_v56  ;;  %v599_v30 = vadd.f32 %v583_v25, %v464_v5 }
 0x162   :  { %v669_v52 = vsub.f32 1.0, %v668_v45  ;;  %v1289_v45 = vmov 2  }
 0x163   :  { %v1820_v54 = vadd.f32 %v1591_v49, %v600_v53  ;;  %v1823_v57 = vadd.f32 %v1591_v49, %v599_v30  ;;  %1229 = vset.pattern.permute.xlu1 %v1289_v45 }
 0x164   :  { %v499_v61 = vpop.permute.xlu1 %498  ;;  %v670_v17 = vmul.f32 %v1241_v47, %v669_v52  ;;  %v1244_v52 = vld [vmem:[%s2002_s5 + $0x38] sm:$0xff] }
 0x165   :  { %v508_v63 = vsel %vm500_vm4, %v483_v21, %v499_v61  ;;  %v516_v48 = vsel %vm500_vm4, %v499_v61, %v483_v21  ;;  %694 = vadd.xlane.f32.xlu2 %v1820_v54  ;;  %663 = vadd.xlane.f32.xlu1 %v1823_v57 }
 0x166   :  { %v537_v13 = vsel %vm1627_vm5, %v508_v63, 0.0  ;;  %v538_v0 = vsel %vm1631_vm6, %v516_v48, 0.0  ;;  %v671_v40 = vadd.f32 %v1241_v47, %v670_v17  ;;  %v1246_v17 = vld [vmem:[%s2002_s5 + $0x28] sm:$0xff] }
 0x167   :  { %v585_v49 = vmul.f32 %v1442_v27, %v537_v13  ;;  %v586_v42 = vmul.f32 %v1442_v27, %v538_v0 }
 0x168   :  { %v673_v50 = vsel %vm672_vm7, %v1241_v47, %v671_v40  ;;  %v1248_v40 = vld [vmem:[%s2002_s5 + $0x18] sm:$0xff] }
 0x169   :  { %v602_v18 = vadd.f32 %v586_v42, %v467_v2  ;;  %v601_v41 = vadd.f32 %v585_v49, %v466_v31 }
 0x16b   :  { %v1843_v19 = vadd.f32 %v1585_v55, %v602_v18  ;;  %v1846_v24 = vadd.f32 %v1585_v55, %v601_v41 }
 0x16c   :  { %v605_v27 = vpop.permute.xlu1 %604 }
 0x16d   :  { %653 = vadd.xlane.f32.xlu1 %v1840_v58  ;;  %696 = vadd.xlane.f32.xlu0 %v1843_v19  ;;  %v1856_v34 = vadd.f32 %v605_v27, %v1643_v29  ;;  %v1866_v55 = vadd.f32 %v605_v27, %v1645_v1 }
 0x16e   :  { %665 = vadd.xlane.f32.xlu2 %v1846_v24 }
 0x175   :  { %686 = vadd.xlane.f32.xlu0 %v1853_v33  ;;  %682 = vadd.xlane.f32.xlu1 %v1856_v34 }
 0x176   :  { %655 = vadd.xlane.f32.xlu2 %v1860_v32 }
 0x17d   :  { %651 = vadd.xlane.f32.xlu0 %v1866_v55 }
 0x17e   :  { %684 = vadd.xlane.f32.xlu2 %v1869_v43 }
 0x191   :  { %718 = vperm.xlu0 %1228, %v1385_v14  }
 0x196   :  { %722 = vperm.xlu2 %1227, %v1390_v15  }
 0x199   :  { %1231 = vset.pattern.permute.xlu0 %v1289_v45 }
 0x19e   :  { %1230 = vset.pattern.permute.xlu2 %v1289_v45 }
 0x19f   :  { %794 = vperm.xlu2 %1230, %v1244_v52  }
 0x1a7   :  { %786 = vperm.xlu2 %1230, %v1246_v17  }
 0x1af   :  { %778 = vperm.xlu2 %1230, %v1248_v40  }
 0x1b0   :  { %v689_v38 = vpop.xlane.xlu1 %688  ;;  %v658_v60 = vpop.xlane.xlu0 %657 }
 0x1b1   :  { %v677_v6 = vmul.f32 %v673_v50, %v658_v60  ;;  %v701_v21 = vmul.f32 %v689_v38, %v673_v50  ;;  %v716_v38 = vld [vmem:[%s1999_s2 + $0x8] sm:$0xff]  ;;  %v1242_v60 = vld [vmem:[%s2002_s5 + $0x30] sm:$0xff] }
 0x1b2   :  { %790 = vperm.xlu1 %1229, %v1242_v60  }
 0x1b3   :  { %v710_v0 = vsel %vm706_vm8, %v677_v6, %v701_v21 }
 0x1b7   :  { %1233 = vset.pattern.permute.xlu2 %v1280_v3 }
 0x1c0   :  { %v691_v29 = vpop.xlane.xlu2 %690  ;;  %v660_v51 = vpop.xlane.xlu1 %659 }
 0x1c1   :  { %v702_v16 = vmul.f32 %v691_v29, %v673_v50  ;;  %v678_v53 = vmul.f32 %v673_v50, %v660_v51  ;;  %v1245_v51 = vld [vmem:[%s2002_s5 + $0x20] sm:$0xff] }
 0x1c2   :  { %782 = vperm.xlu1 %1229, %v1245_v51  }
 0x1c3   :  { %v711_v13 = vsel %vm706_vm8, %v678_v53, %v702_v16  ;;  %v762_v16 = vld [vmem:[%s2000_s3 + $0x28] sm:$0xff]  ;;  %v763_v53 = vld [vmem:[%s2000_s3 + $0x30] sm:$0xff] }
 0x1c8   :  { %v662_v39 = vpop.xlane.xlu2 %661  ;;  %v693_v1 = vpop.xlane.xlu0 %692 }
 0x1c9   :  { %v703_v56 = vmul.f32 %v693_v1, %v673_v50  ;;  %v679_v5 = vmul.f32 %v673_v50, %v662_v39  ;;  %v1897_v39 = vld [vmem:[%s2002_s5] sm:$0xff] }
 0x1ca   :  { %766 = vperm.xlu0 %1231, %v1897_v39  }
 0x1cb   :  { %v712_v63 = vsel %vm706_vm8, %v679_v5, %v703_v56  ;;  %v758_v56 = vld [vmem:[%s2000_s3 + $0x8] sm:$0xff]  ;;  %v759_v5 = vld [vmem:[%s2000_s3 + $0x10] sm:$0xff] }
 0x1d2   :  { %1234 = vset.pattern.permute.xlu0 %v1280_v3 }
 0x1d8   :  { %v695_v35 = vpop.xlane.xlu2 %694  ;;  %v664_v37 = vpop.xlane.xlu1 %663 }
 0x1d9   :  { %v704_v20 = vmul.f32 %v695_v35, %v673_v50  ;;  %v680_v25 = vmul.f32 %v673_v50, %v664_v37  ;;  %v1247_v35 = vld [vmem:[%s2002_s5 + $0x10] sm:$0xff] }
 0x1da   :  { %774 = vperm.xlu1 %1229, %v1247_v35  }
 0x1db   :  { %v713_v30 = vsel %vm706_vm8, %v680_v25, %v704_v20 }
 0x1e0   :  { %v697_v12 = vpop.xlane.xlu0 %696  ;;  %v654_v62 = vpop.xlane.xlu1 %653 }
 0x1e1   :  { %v705_v8 = vmul.f32 %v697_v12, %v673_v50  ;;  %v666_v11 = vpop.xlane.xlu2 %665  ;;  %v675_v44 = vmul.f32 %v673_v50, %v654_v62 }
 0x1e2   :  { %v681_v36 = vmul.f32 %v673_v50, %v666_v11  ;;  %770 = vperm.xlu1 %1229, %v1919_v4  }
 0x1e4   :  { %v714_v26 = vsel %vm706_vm8, %v681_v36, %v705_v8  ;;  %v757_v36 = vld [vmem:[%s2000_s3] sm:$0xff] }
 0x1e5   :  { %740 = vmatpush.msra.mxu2 %v714_v26  ;;  %v760_v26 = vld [vmem:[%s2000_s3 + $0x18] sm:$0xff] }
 0x1e7   :  { %741 = vmatpush.msra.mxu2 %v713_v30  ;;  %v764_v30 = vld [vmem:[%s2000_s3 + $0x38] sm:$0xff] }
 0x1e8   :  { %v687_v61 = vpop.xlane.xlu0 %686  ;;  %v683_v2 = vpop.xlane.xlu1 %682 }
 0x1e9   :  { %v656_v14 = vpop.xlane.xlu2 %655  ;;  %742 = vmatpush.msra.mxu2 %v712_v63  ;;  %v700_v15 = vmul.f32 %v687_v61, %v673_v50  ;;  %v698_v27 = vmul.f32 %v683_v2, %v673_v50 }
 0x1ea   :  { %v676_v48 = vmul.f32 %v673_v50, %v656_v14  ;;  %1232 = vset.pattern.permute.xlu1 %v1280_v3  ;;  %v761_v3 = vld [vmem:[%s2000_s3 + $0x20] sm:$0xff] }
 0x1eb   :  { %743 = vmatpush.msra.mxu2 %v711_v13 }
 0x1ec   :  { %v709_v49 = vsel %vm706_vm8, %v676_v48, %v700_v15 }
 0x1ed   :  { %744 = vmatpush.msra.mxu2 %v710_v0 }
 0x1ef   :  { %745 = vmatpush.msra.mxu2 %v709_v49 }
 0x1f0   :  { %v652_v42 = vpop.xlane.xlu0 %651 }
 0x1f1   :  { %v685_v31 = vpop.xlane.xlu2 %684  ;;  %v674_v41 = vmul.f32 %v673_v50, %v652_v42 }
 0x1f2   :  { %v699_v18 = vmul.f32 %v685_v31, %v673_v50 }
 0x1f3   :  { %v707_v47 = vsel %vm706_vm8, %v674_v41, %v698_v27 }
 0x1f4   :  { %v708_v29 = vsel %vm706_vm8, %v675_v44, %v699_v18 }
 0x1f5   :  { %746 = vmatpush.msra.mxu2 %v708_v29 }
 0x1f7   :  { %747 = vmatpush.msra.mxu2 %v707_v47 }
 0x1f8   :  { %1166 = vmatmul.msk.f32.vlgmr.msra.gmra.mxu2 %vm725_vm9, %v715_v9 }
 0x1f9   :  { %v723_v50 = vpop.permute.xlu2 %722 }
 0x200   :  { %1167 = vmatmul.msk.f32.gmra.mxu2 %vm725_vm9, %v716_v38 }
 0x201   :  { %v795_v21 = vpop.permute.xlu2 %794 }
 0x203   :  { %v719_v37 = vpop.permute.xlu0 %718 }
 0x209   :  { %v787_v14 = vpop.permute.xlu2 %786 }
 0x211   :  { %v779_v42 = vpop.permute.xlu2 %778 }
 0x224   :  { %v791_v62 = vpop.permute.xlu1 %790 }
 0x234   :  { %v783_v61 = vpop.permute.xlu1 %782 }
 0x24c   :  { %v775_v15 = vpop.permute.xlu1 %774 }
 0x27b   :  { %v749_v1 = vpop.f32.mrf.mxu2 }
 0x27c   :  { %v750_v8 = vadd.f32 %v749_v1, %v719_v37  ;;  %v771_v37 = vpop.permute.xlu1 %770 }
 0x27e   :  { %v755_v25 = vmax.f32 %v750_v8, 0.0 }
 0x283   :  { %v752_v12 = vpop.f32.mrf.mxu2 }
 0x284   :  { %v753_v11 = vadd.f32 %v752_v12, %v723_v50 }
 0x286   :  { %v756_v20 = vmax.f32 %v753_v11, 0.0 }
 0x288   :  { %835 = vmatpush.msra.mxu3 %v756_v20 }
 0x28a   :  { %836 = vmatpush.msra.mxu3 %v755_v25 }
 0x28b   :  { %1168 = vmatmul.msk.f32.vlgmr.msra.gmra.mxu3 %vm107_vm0, %v757_v36 }
 0x293   :  { %1169 = vmatmul.msk.f32.gmra.mxu3 %vm107_vm0, %v758_v56 }
 0x29b   :  { %1170 = vmatmul.msk.f32.gmra.mxu3 %vm107_vm0, %v759_v5  ;;  %v767_v5 = vpop.permute.xlu0 %766 }
 0x2a3   :  { %1171 = vmatmul.msk.f32.gmra.mxu3 %vm107_vm0, %v760_v26 }
 0x2ab   :  { %1172 = vmatmul.msk.f32.gmra.mxu3 %vm107_vm0, %v761_v3 }
 0x2b3   :  { %1173 = vmatmul.msk.f32.gmra.mxu3 %vm107_vm0, %v762_v16 }
 0x2bb   :  { %1174 = vmatmul.msk.f32.gmra.mxu3 %vm107_vm0, %v763_v53 }
 0x2c3   :  { %1175 = vmatmul.msk.f32.gmra.mxu3 %vm107_vm0, %v764_v30 }
 0x30e   :  { %v838_v6 = vpop.f32.mrf.mxu3 }
 0x30f   :  { %v839_v16 = vadd.f32 %v838_v6, %v767_v5 }
 0x316   :  { %v841_v63 = vpop.f32.mrf.mxu3 }
 0x317   :  { %v842_v8 = vadd.f32 %v841_v63, %v771_v37 }
 0x319   :  { %v863_v36 = vadd.f32 3.0, %v842_v8 }
 0x31b   :  { %v871_v53 = vmax.f32 %v863_v36, 0.0 }
 0x31d   :  { %v879_v63 = vmin.f32 %v871_v53, 6.0 }
 0x31e   :  { %v844_v48 = vpop.f32.mrf.mxu3 }
 0x31f   :  { %v845_v13 = vadd.f32 %v844_v48, %v775_v15  ;;  %v862_v15 = vadd.f32 3.0, %v839_v16 }
 0x321   :  { %v864_v0 = vadd.f32 3.0, %v845_v13  ;;  %v870_v13 = vmax.f32 %v862_v15, 0.0 }
 0x323   :  { %v872_v49 = vmax.f32 %v864_v0, 0.0  ;;  %v887_v0 = vmul.f32 0.16666667, %v879_v63 }
 0x325   :  { %v880_v2 = vmin.f32 %v872_v49, 6.0 }
 0x326   :  { %v847_v31 = vpop.f32.mrf.mxu3 }
 0x327   :  { %v888_v44 = vmul.f32 0.16666667, %v880_v2  ;;  %v848_v18 = vadd.f32 %v847_v31, %v779_v42  ;;  %v878_v42 = vmin.f32 %v870_v13, 6.0 }
 0x329   :  { %v865_v41 = vadd.f32 3.0, %v848_v18  ;;  %906 = vperm.xlu1 %1232, %v888_v44   ;;  %v886_v6 = vmul.f32 0.16666667, %v878_v42 }
 0x32b   :  { %v873_v27 = vmax.f32 %v865_v41, 0.0 }
 0x32d   :  { %v881_v29 = vmin.f32 %v873_v27, 6.0 }
 0x32e   :  { %v850_v9 = vpop.f32.mrf.mxu3 }
 0x32f   :  { %v889_v47 = vmul.f32 0.16666667, %v881_v29  ;;  %v851_v38 = vadd.f32 %v850_v9, %v783_v61 }
 0x331   :  { %v866_v45 = vadd.f32 3.0, %v851_v38  ;;  %911 = vperm.xlu2 %1233, %v889_v47  }
 0x333   :  { %v874_v60 = vmax.f32 %v866_v45, 0.0 }
 0x335   :  { %v882_v52 = vmin.f32 %v874_v60, 6.0 }
 0x336   :  { %v853_v51 = vpop.f32.mrf.mxu3 }
 0x337   :  { %v890_v17 = vmul.f32 0.16666667, %v882_v52  ;;  %v854_v1 = vadd.f32 %v853_v51, %v787_v14 }
 0x339   :  { %v867_v35 = vadd.f32 3.0, %v854_v1  ;;  %916 = vperm.xlu2 %1233, %v890_v17  }
 0x33b   :  { %v875_v40 = vmax.f32 %v867_v35, 0.0 }
 0x33d   :  { %v883_v50 = vmin.f32 %v875_v40, 6.0 }
 0x33e   :  { %v856_v12 = vpop.f32.mrf.mxu3 }
 0x33f   :  { %v891_v11 = vmul.f32 0.16666667, %v883_v50  ;;  %v857_v20 = vadd.f32 %v856_v12, %v791_v62 }
 0x341   :  { %v868_v25 = vadd.f32 3.0, %v857_v20  ;;  %921 = vperm.xlu0 %1234, %v891_v11  }
 0x343   :  { %v876_v56 = vmax.f32 %v868_v25, 0.0 }
 0x345   :  { %v884_v26 = vmin.f32 %v876_v56, 6.0 }
 0x346   :  { %v859_v3 = vpop.f32.mrf.mxu3 }
 0x347   :  { %v892_v30 = vmul.f32 0.16666667, %v884_v26  ;;  %v860_v61 = vadd.f32 %v859_v3, %v795_v21 }
 0x349   :  { %v869_v14 = vadd.f32 3.0, %v860_v61  ;;  %1235 = vset.pattern.permute.xlu0 %v1284_v22  ;;  %926 = vperm.xlu2 %1233, %v892_v30  }
 0x34a   :  { %967 = vperm.xlu0 %1235, %v892_v30  }
 0x34b   :  { %v877_v48 = vmax.f32 %v869_v14, 0.0 }
 0x34d   :  { %v885_v62 = vmin.f32 %v877_v48, 6.0 }
 0x34f   :  { %v893_v49 = vmul.f32 0.16666667, %v885_v62 }
 0x351   :  { %931 = vperm.xlu1 %1232, %v893_v49   ;;  %901 = vperm.xlu2 %1233, %v887_v0  }
 0x352   :  { %955 = vperm.xlu0 %1235, %v889_v47  }
 0x359   :  { %1236 = vset.pattern.permute.xlu2 %v1284_v22  ;;  %896 = vperm.xlu1 %1232, %v886_v6  }
 0x35a   :  { %959 = vperm.xlu2 %1236, %v890_v17  }
 0x361   :  { %1237 = vset.pattern.permute.xlu1 %v1284_v22 }
 0x362   :  { %951 = vperm.xlu2 %1236, %v888_v44   ;;  %971 = vperm.xlu1 %1237, %v893_v49  }
 0x36a   :  { %947 = vperm.xlu2 %1236, %v887_v0   ;;  %963 = vperm.xlu1 %1237, %v891_v11  }
 0x372   :  { %943 = vperm.xlu1 %1237, %v886_v6  }
 0x38b   :  { %v912_v21 = vpop.permute.xlu2 %911 }
 0x38c   :  { %v937_v45 = vmul.f32 %v912_v21, %v1721_v7 }
 0x38e   :  { %v988_v40 = vadd.f32 3.0, %v937_v45 }
 0x390   :  { %v1004_v20 = vmax.f32 %v988_v40, 0.0 }
 0x392   :  { %v1020_v30 = vmin.f32 %v1004_v20, 6.0 }
 0x393   :  { %v917_v2 = vpop.permute.xlu2 %916 }
 0x394   :  { %v938_v47 = vmul.f32 %v917_v2, %v1761_v23  ;;  %v1036_v6 = vmul.f32 %v1020_v30, %v937_v45 }
 0x396   :  { %v990_v60 = vadd.f32 3.0, %v938_v47 }
 0x398   :  { %v1006_v37 = vmax.f32 %v990_v60, 0.0 }
 0x39a   :  { %v1022_v7 = vmin.f32 %v1006_v37, 6.0 }
 0x39b   :  { %v907_v29 = vpop.permute.xlu1 %906 }
 0x39c   :  { %v936_v22 = vmul.f32 %v907_v29, %v1860_v32 }
 0x39e   :  { %v986_v17 = vadd.f32 3.0, %v936_v22 }
 0x3a0   :  { %v1002_v12 = vmax.f32 %v986_v17, 0.0 }
 0x3a2   :  { %v1018_v3 = vmin.f32 %v1002_v12, 6.0 }
 0x3a3   :  { %v927_v31 = vpop.permute.xlu2 %926 }
 0x3a4   :  { %v940_v41 = vmul.f32 %v927_v31, %v1823_v57  ;;  %v1034_v13 = vmul.f32 %v1018_v3, %v936_v22 }
 0x3a6   :  { %v994_v38 = vadd.f32 3.0, %v940_v41 }
 0x3a8   :  { %v1010_v52 = vmax.f32 %v994_v38, 0.0 }
 0x3aa   :  { %v1026_v50 = vmin.f32 %v1010_v52, 6.0 }
 0x3ab   :  { %v902_v27 = vpop.permute.xlu2 %901 }
 0x3ac   :  { %v1042_v25 = vmul.f32 %v1026_v50, %v940_v41  ;;  %v1050_v41 = vmul.f32 0.16666667, %v1034_v13 }
 0x3ae   :  { %v1058_v61 = vmul.f32 0.16666667, %v1042_v25 }
 0x3b3   :  { %v922_v18 = vpop.permute.xlu0 %921 }
 0x3b4   :  { %v939_v9 = vmul.f32 %v922_v18, %v1781_v28  ;;  %v960_v35 = vpop.permute.xlu2 %959  ;;  %v935_v28 = vmul.f32 %v902_v27, %v1840_v58  ;;  %v1038_v58 = vmul.f32 %v1022_v7, %v938_v47  ;;  %v1052_v47 = vmul.f32 0.16666667, %v1036_v6 }
 0x3b5   :  { %v978_v2 = vmul.f32 %v960_v35, %v1758_v46 }
 0x3b6   :  { %v992_v44 = vadd.f32 3.0, %v939_v9  ;;  %v984_v36 = vadd.f32 3.0, %v935_v28  ;;  %v1066_v35 = vpack.c.bf16 %v1052_v47, %v1050_v41 }
 0x3b7   :  { %v991_v60 = vadd.f32 3.0, %v978_v2 }
 0x3b8   :  { %v1008_v1 = vmax.f32 %v992_v44, 0.0  ;;  %v1000_v14 = vmax.f32 %v984_v36, 0.0 }
 0x3b9   :  { %v1007_v40 = vmax.f32 %v991_v60, 0.0 }
 0x3ba   :  { %v1024_v8 = vmin.f32 %v1008_v1, 6.0  ;;  %v1016_v21 = vmin.f32 %v1000_v14, 6.0 }
 0x3bc   :  { %v968_v32 = vpop.permute.xlu0 %967  ;;  %v952_v15 = vpop.permute.xlu2 %951  ;;  %v1032_v44 = vmul.f32 %v1016_v21, %v935_v28 }
 0x3bd   :  { %v980_v5 = vmul.f32 %v968_v32, %v1820_v54  ;;  %v1054_v54 = vmul.f32 0.16666667, %v1038_v58  ;;  %v976_v45 = vmul.f32 %v952_v15, %v1853_v33 }
 0x3bf   :  { %v995_v62 = vadd.f32 3.0, %v980_v5  ;;  %v987_v37 = vadd.f32 3.0, %v976_v45 }
 0x3c1   :  { %v1003_v20 = vmax.f32 %v987_v37, 0.0 }
 0x3c3   :  { %v932_v51 = vpop.permute.xlu1 %931 }
 0x3c4   :  { %v941_v57 = vmul.f32 %v932_v51, %v1846_v24  ;;  %v1040_v24 = vmul.f32 %v1024_v8, %v939_v9  ;;  %v956_v31 = vpop.permute.xlu0 %955  ;;  %v1290_v51 = vmov 3   ;;  %v948_v17 = vpop.permute.xlu2 %947 }
 0x3c5   :  { %v977_v38 = vmul.f32 %v956_v31, %v1718_v59  ;;  %1238 = vset.pattern.permute.xlu0 %v1290_v51  ;;  %1239 = vset.pattern.permute.xlu1 %v1290_v51  ;;  %v975_v50 = vmul.f32 %v948_v17, %v1869_v43 }
 0x3c6   :  { %v996_v23 = vadd.f32 3.0, %v941_v57  ;;  %v1056_v0 = vmul.f32 0.16666667, %v1040_v24  ;;  %1073 = vperm.xlu0 %1238, %v1897_v39   ;;  %1077 = vperm.xlu1 %1239, %v1919_v4   ;;  %v1186_v39 = vld [vmem:[%s2001_s4] sm:$0xff]  ;;  %v1023_v4 = vmin.f32 %v1007_v40, 6.0  ;;  %v1019_v24 = vmin.f32 %v1003_v20, 6.0 }
 0x3c7   :  { %v989_v59 = vadd.f32 3.0, %v977_v38  ;;  %v985_v25 = vadd.f32 3.0, %v975_v50 }
 0x3c8   :  { %v1012_v11 = vmax.f32 %v996_v23, 0.0  ;;  %v1068_v9 = vpack.c.bf16 %v1056_v0, %v1054_v54  ;;  %v1039_v3 = vmul.f32 %v1023_v4, %v978_v2  ;;  %v1035_v15 = vmul.f32 %v1019_v24, %v976_v45 }
 0x3c9   :  { %v1005_v8 = vmax.f32 %v989_v59, 0.0 }
 0x3ca   :  { %v1028_v56 = vmin.f32 %v1012_v11, 6.0  ;;  %v1055_v14 = vmul.f32 0.16666667, %v1039_v3 }
 0x3cb   :  { %v897_v26 = vpop.permute.xlu1 %896 }
 0x3cc   :  { %v1044_v16 = vmul.f32 %v1028_v56, %v941_v57  ;;  %v934_v53 = vmul.f32 %v897_v26, %v1866_v55  ;;  %v1011_v55 = vmax.f32 %v995_v62, 0.0 }
 0x3ce   :  { %v1060_v63 = vmul.f32 0.16666667, %v1044_v16  ;;  %v982_v48 = vadd.f32 3.0, %v934_v53  ;;  %v1027_v52 = vmin.f32 %v1011_v55, 6.0  ;;  %v1001_v16 = vmax.f32 %v985_v25, 0.0 }
 0x3d0   :  { %v998_v49 = vmax.f32 %v982_v48, 0.0  ;;  %v1070_v42 = vpack.c.bf16 %v1060_v63, %v1058_v61  ;;  %v1043_v33 = vmul.f32 %v1027_v52, %v980_v5  ;;  %v1021_v5 = vmin.f32 %v1005_v8, 6.0 }
 0x3d1   :  { %v1017_v63 = vmin.f32 %v1001_v16, 6.0 }
 0x3d2   :  { %v1014_v18 = vmin.f32 %v998_v49, 6.0  ;;  %1092 = vmatpush.bf16.msrb.mxu2 %v1070_v42  ;;  %v1059_v7 = vmul.f32 0.16666667, %v1043_v33  ;;  %v1037_v30 = vmul.f32 %v1021_v5, %v977_v38  ;;  %v1051_v42 = vmul.f32 0.16666667, %v1035_v15 }
 0x3d3   :  { %v1033_v6 = vmul.f32 %v1017_v63, %v975_v50 }
 0x3d4   :  { %v1030_v27 = vmul.f32 %v1014_v18, %v934_v53  ;;  %v972_v29 = vpop.permute.xlu1 %971  ;;  %v1053_v13 = vmul.f32 0.16666667, %v1037_v30 }
 0x3d5   :  { %v981_v22 = vmul.f32 %v972_v29, %v1843_v19  ;;  %v1048_v19 = vmul.f32 0.16666667, %v1032_v44  ;;  %v1049_v31 = vmul.f32 0.16666667, %v1033_v6  ;;  %v1250_v29 = vld [vmem:[%s1997_s0] sm:$0xff]  ;;  %v1251_v44 = vld [vmem:[%s1997_s0 + $0x10] sm:$0xff] }
 0x3d6   :  { %1093 = vmatpush.bf16.msrb.mxu2 %v1068_v9  ;;  %v1046_v1 = vmul.f32 0.16666667, %v1030_v27  ;;  %v1067_v2 = vpack.c.bf16 %v1053_v13, %v1051_v42 }
 0x3d7   :  { %v997_v46 = vadd.f32 3.0, %v981_v22 }
 0x3d8   :  { %v1064_v12 = vpack.c.bf16 %v1048_v19, %v1046_v1 }
 0x3d9   :  { %v1013_v57 = vmax.f32 %v997_v46, 0.0  ;;  %v1252_v46 = vld [vmem:[%s1997_s0 + $0x8] sm:$0xff] }
 0x3da   :  { %1094 = vmatpush.bf16.msrb.mxu2 %v1066_v35  ;;  %v1253_v35 = vld [vmem:[%s1997_s0 + $0x18] sm:$0xff] }
 0x3db   :  { %v1029_v28 = vmin.f32 %v1013_v57, 6.0 }
 0x3dc   :  { %v964_v23 = vpop.permute.xlu1 %963 }
 0x3dd   :  { %v1045_v32 = vmul.f32 %v1029_v28, %v981_v22  ;;  %v979_v11 = vmul.f32 %v964_v23, %v1778_v10 }
 0x3de   :  { %1095 = vmatpush.bf16.msrb.mxu2 %v1064_v12 }
 0x3df   :  { %v1061_v36 = vmul.f32 0.16666667, %v1045_v32  ;;  %v993_v56 = vadd.f32 3.0, %v979_v11 }
 0x3e1   :  { %v1071_v43 = vpack.c.bf16 %v1061_v36, %v1059_v7  ;;  %v1009_v26 = vmax.f32 %v993_v56, 0.0  ;;  %1180 = vmatmul.msk.bf16.vlgmr.msrb.gmra.mxu2 %vm725_vm9, %v1186_v39 }
 0x3e3   :  { %v1025_v10 = vmin.f32 %v1009_v26, 6.0  ;;  %1106 = vmatpush.bf16.msra.mxu2 %v1071_v43 }
 0x3e4   :  { %v944_v53 = vpop.permute.xlu1 %943 }
 0x3e5   :  { %v1041_v58 = vmul.f32 %v1025_v10, %v979_v11  ;;  %v974_v61 = vmul.f32 %v944_v53, %v1856_v34 }
 0x3e7   :  { %v1057_v48 = vmul.f32 0.16666667, %v1041_v58  ;;  %v983_v62 = vadd.f32 3.0, %v974_v61 }
 0x3e9   :  { %v999_v0 = vmax.f32 %v983_v62, 0.0  ;;  %v1069_v49 = vpack.c.bf16 %v1057_v48, %v1055_v14 }
 0x3eb   :  { %v1015_v54 = vmin.f32 %v999_v0, 6.0  ;;  %1107 = vmatpush.bf16.msra.mxu2 %v1069_v49 }
 0x3ed   :  { %v1031_v21 = vmul.f32 %v1015_v54, %v974_v61 }
 0x3ef   :  { %v1047_v18 = vmul.f32 0.16666667, %v1031_v21  ;;  %1108 = vmatpush.bf16.msra.mxu2 %v1067_v2 }
 0x3f1   :  { %v1065_v55 = vpack.c.bf16 %v1049_v31, %v1047_v18 }
 0x3f3   :  { %1109 = vmatpush.bf16.msra.mxu2 %v1065_v55 }
 0x3f6   :  { %1181 = vmatmul.msk.bf16.vlgmr.msra.gmra.mxu2 %vm725_vm9, %v1186_v39 }
 0x438   :  { %v1074_v34 = vpop.permute.xlu0 %1073  ;;  %v1078_v47 = vpop.permute.xlu1 %1077 }
 0x464   :  { %v1097_v41 = vpop.f32.mrf.mxu2 }
 0x465   :  { %v1098_v27 = vadd.f32 %v1097_v41, %v1074_v34 }
 0x467   :  { %v1116_v9 = vadd.f32 %v1250_v29, %v1098_v27 }
 0x469   :  { %1120 = vst [vmem:[#allocation2] sm:$0xff] %v1116_v9 }
 0x46c   :  { %v1099_v38 = vpop.f32.mrf.mxu2 }
 0x46d   :  { %v1100_v22 = vadd.f32 %v1099_v38, %v1078_v47 }
 0x46f   :  { %v1118_v60 = vadd.f32 %v1251_v44, %v1100_v22 }
 0x471   :  { %1122 = vst [vmem:[#allocation2 + $0x10] sm:$0xff] %v1118_v60 }
 0x479   :  { %v1111_v45 = vpop.f32.mrf.mxu2 }
 0x47a   :  { %v1112_v52 = vadd.f32 %v1111_v45, %v1074_v34 }
 0x47c   :  { %v1117_v51 = vadd.f32 %v1252_v46, %v1112_v52 }
 0x47e   :  { %1121 = vst [vmem:[#allocation2 + $0x8] sm:$0xff] %v1117_v51 }
 0x481   :  { %v1113_v17 = vpop.f32.mrf.mxu2 }
 0x482   :  { %v1114_v1 = vadd.f32 %v1113_v17, %v1078_v47 }
 0x484   :  { %v1119_v59 = vadd.f32 %v1253_v35, %v1114_v1 }
 0x486   :  { %1123 = vst [vmem:[#allocation2 + $0x18] sm:$0xff] %v1119_v59 }
 0x487   :  { %1136 = dma.vmem_to_hbm [thread:$0]  %s1129_s21, 512, %s1131_s24, [#allocation3], %s1292_s27, %s1292_s27, %s1293_s28  }
 0x488   :  { %1278 = dma.done.wait [#allocation3], 512  }
 0x489   :  { %1279 = vsyncadd [#allocation3], 4294966784 }
 0x48a   :  { %1141 = vsyncpa [#allocation3], 1 }

</bundles_post_ra>
